<compile_context>
chip_gen: v6e
topology: v6e:2x2x1
jax: 0.10.0
libtpu: 0.0.40
codegen_flags: <defaults>
</compile_context>

<pallas_src>
import functools

import jax
import jax.numpy as jnp
import numpy as np
from jax.experimental import pallas as pl
from jax.experimental.pallas import tpu as pltpu


def _round_up(x, m):
    return ((x + m - 1) // m) * m


def _choose_spatial_tile(S, B, D, Kp, cap=4096, vmem_budget=24 << 20):
    """Largest lane-dense spatial tile whose working set fits ~vmem_budget.

    The TS-scaling VMEM terms are: x + q blocks (double-buffered), the
    (Kp, TS) score / one-hot / iota intermediates, the (D, TS) diff and the
    idx block.  The budget is chosen to fit the default scoped VMEM on every
    generation (16 MiB v5e, 32 MiB v6e/v7x) with headroom.
    """
    per_col = 4 * (4 * D + 3 * Kp + 2 * D + 2)
    fit = max(128, (vmem_budget // per_col) // 128 * 128)
    cap = max(128, min(cap, fit))
    if S <= cap:
        ts = S
        # Ensure >= 2 grid steps so the second TensorCore (v7x megacore) is
        # not idle when the batch axis alone provides only one step.
        if B == 1 and S >= 256 and S % 256 == 0:
            ts = S // 2
        return ts
    return cap  # multiple of 128; a partial last block is handled in-kernel


def vq_kernel(x_ref, e_ref, he2_ref, q_ref, idx_ref, sse_ref, *,
              s_total, block_s):
    """One (batch, spatial-tile) cell of the VQ forward.

    x_ref:   (1, D, TS)   f32 activations (channels-first, spatial on lanes)
    e_ref:   (Kp, D)      f32 codebook, K padded to a multiple of 128 (zeros)
    he2_ref: (Kp, 1)      f32 0.5*||e||^2 per code (padded rows set huge)
    q_ref:   (1, D, TS)   f32 quantized output
    idx_ref: (1, 1, TS)   i32 encoding indices (lane-dense)
    sse_ref: (1, 1, 1, 1) f32 partial sum of squared errors for this cell
    """
    x = x_ref[0]            # (D, TS)
    e = e_ref[...]          # (Kp, D)
    he2 = he2_ref[...]      # (Kp, 1)

    D, TS = x.shape
    Kp = e.shape[0]

    # argmin_k ||x_s - e_k||^2  ==  argmax_k (e_k . x_s - 0.5 * ||e_k||^2)
    dots = jax.lax.dot_general(e, x, (((1,), (0,)), ((), ())),
                               preferred_element_type=jnp.float32)   # (Kp, TS)
    score = dots - he2                                               # (Kp, TS)

    best = jnp.max(score, axis=0, keepdims=True)                     # (1, TS)
    iota_k = jax.lax.broadcasted_iota(
        jnp.int32, (Kp, TS), 0).astype(jnp.float32)                  # (Kp, TS)
    # First-occurrence argmax (matches torch.argmin's first-match tie rule).
    idx_f = jnp.min(jnp.where(score >= best, iota_k, jnp.float32(Kp)),
                    axis=0, keepdims=True)                           # (1, TS)
    idx_ref[0] = idx_f.astype(jnp.int32)

    # Embedding lookup as a one-hot matmul contracting over Kp (MXU-friendly).
    onehot = (iota_k == idx_f).astype(jnp.float32)                   # (Kp, TS)
    q = jax.lax.dot_general(e, onehot, (((0,), (0,)), ((), ())),
                            preferred_element_type=jnp.float32)      # (D, TS)
    q_ref[0] = q

    # Per-cell partial SSE.  The tail mask is emitted only when the spatial
    # extent is not a multiple of the tile, and only runs on the last tile.
    diff = q - x
    if s_total % block_s != 0:
        si = pl.program_id(1)
        is_last = si == pl.num_programs(1) - 1

        @pl.when(is_last)
        def _():
            col = si * block_s + jax.lax.broadcasted_iota(
                jnp.int32, (D, TS), 1)
            md = jnp.where(col < s_total, diff, 0.0)
            sse_ref[...] = jnp.sum(md * md).reshape(1, 1, 1, 1)

        @pl.when(jnp.logical_not(is_last))
        def _():
            sse_ref[...] = jnp.sum(diff * diff).reshape(1, 1, 1, 1)
    else:
        sse_ref[...] = jnp.sum(diff * diff).reshape(1, 1, 1, 1)


def _build_vq_call(B, D, S, TS, num_s, Kp, kernel, vmem_limit, flops,
                   bytes_accessed, single_buffer_codebook):
    resident_kwargs = (
        dict(pipeline_mode=pl.Buffered(1)) if single_buffer_codebook else {})
    return pl.pallas_call(
        kernel,
        out_shape=(
            jax.ShapeDtypeStruct((B, D, S), jnp.float32),        # quantized
            jax.ShapeDtypeStruct((B, 1, S), jnp.int32),          # indices
            jax.ShapeDtypeStruct((B, num_s, 1, 1), jnp.float32),  # SSE partials
        ),
        grid=(B, num_s),
        in_specs=[
            pl.BlockSpec((1, D, TS), lambda b, s: (b, 0, s)),     # x tile
            pl.BlockSpec((Kp, D), lambda b, s: (0, 0),            # codebook
                         **resident_kwargs),
            pl.BlockSpec((Kp, 1), lambda b, s: (0, 0),            # 0.5||e||^2
                         **resident_kwargs),
        ],
        out_specs=(
            pl.BlockSpec((1, D, TS), lambda b, s: (b, 0, s)),
            pl.BlockSpec((1, 1, TS), lambda b, s: (b, 0, s)),
            pl.BlockSpec((1, 1, 1, 1), lambda b, s: (b, s, 0, 0)),
        ),
        compiler_params=pltpu.CompilerParams(
            dimension_semantics=("parallel", "parallel"),
            vmem_limit_bytes=vmem_limit,
        ),
        cost_estimate=pl.CostEstimate(
            flops=flops, transcendentals=0, bytes_accessed=bytes_accessed),
    )


def vector_quantizer_forward(inputs, embedding, commitment_cost,
                             max_spatial_tile=4096):
    """Forward pass of the VectorQuantizer module.

    inputs:    (B, C, L) or (B, C, H, W) float with C == embedding_dim
    embedding: (K, D) float32 codebook
    Returns (quantized_st, vq_loss, encoding_indices) with the same layouts
    as the PyTorch module's forward.
    """
    K, D = embedding.shape
    ndim = inputs.ndim
    if ndim not in (3, 4):
        raise ValueError(f"Input tensor dimensions {ndim} not supported.")
    if inputs.shape[1] != D:
        raise ValueError("channel dim must equal embedding_dim")

    B = int(inputs.shape[0])
    spatial_dims = tuple(int(d) for d in inputs.shape[2:])
    S = 1
    for d in spatial_dims:
        S *= d

    # Metadata-only reshape (merging contiguous trailing dims); stays
    # channels-first, so there is no transpose / pad HBM pass.
    x = inputs.reshape(B, D, S).astype(jnp.float32)

    # Codebook: pad K to a lane multiple, precompute 0.5*||e||^2 once.
    Kp = _round_up(max(K, 1), 128)
    e_pad = jnp.zeros((Kp, D), jnp.float32).at[:K].set(
        embedding.astype(jnp.float32))
    he2 = 0.5 * jnp.sum(e_pad * e_pad, axis=1)
    he2 = jnp.where(jnp.arange(Kp) < K, he2, jnp.float32(1e30))[:, None]

    TS = _choose_spatial_tile(S, B, D, Kp, cap=max_spatial_tile)
    num_s = pl.cdiv(S, TS)

    kernel = functools.partial(vq_kernel, s_total=S, block_s=TS)

    # Scheduling hints + a VMEM request that tracks actual need (+ headroom),
    # rather than a fixed v6e-era cap (v7x only has 64 MiB physical VMEM).
    flops = 4 * B * num_s * TS * Kp * D              # two MXU matmuls / tile
    bytes_accessed = 4 * (2 * B * S * D + Kp * D + Kp + B * S + B * num_s)
    per_col = 4 * (4 * D + 3 * Kp + 2 * D + 2)
    vmem_need = TS * per_col + 4 * (Kp * D + Kp) * 4 + (1 << 20)
    vmem_limit = int(min(112 << 20, max(16 << 20, int(1.25 * vmem_need))))

    args = (B, D, S, TS, num_s, Kp, kernel, vmem_limit, flops, bytes_accessed)
    try:
        q_out, idx_out, sse_out = _build_vq_call(
            *args, single_buffer_codebook=True)(x, e_pad, he2)
    except Exception:
        # Older jax without BlockSpec(pipeline_mode=...): fall back to the
        # default double-buffered resident codebook (~32 KiB extra VMEM).
        q_out, idx_out, sse_out = _build_vq_call(
            *args, single_buffer_codebook=False)(x, e_pad, he2)

    # --- wrapper-side finalization ------------------------------------------
    sse = jnp.sum(sse_out)
    mse = sse / jnp.float32(B * S * D)
    # e_latent_loss == q_latent_loss in the forward pass (detach only affects
    # gradients), so vq_loss = mse * (1 + commitment_cost).
    vq_loss = mse * jnp.float32(1.0 + commitment_cost)

    # TODO(synk): straight-through estimator x + (q - x).detach() only differs
    # from q in its gradient; the forward value is exactly the quantized tensor.
    quantized_st = q_out.reshape(inputs.shape)           # metadata-only reshape
    indices = idx_out.reshape((B,) + spatial_dims)
    return quantized_st, vq_loss, indices


def _reference_forward(inputs, embedding, commitment_cost):
    """Pure-JAX reference mirroring the PyTorch forward (3-D and 4-D)."""
    K, D = embedding.shape
    if inputs.ndim == 3:
        xp = jnp.transpose(inputs, (0, 2, 1))
        inv = (0, 2, 1)
    else:
        xp = jnp.transpose(inputs, (0, 2, 3, 1))
        inv = (0, 3, 1, 2)
    spatial = xp.shape[:-1]
    flat = xp.reshape(-1, D)
    dist = (jnp.sum(flat ** 2, 1, keepdims=True) + jnp.sum(embedding ** 2, 1)
            - 2.0 * flat @ embedding.T)
    idx = jnp.argmin(dist, axis=1)
    q = embedding[idx]
    mse = jnp.mean((q - flat) ** 2)
    loss = mse + commitment_cost * mse
    q_st = jnp.transpose(q.reshape(*spatial, D), inv)
    return q_st, loss, idx.reshape(spatial).astype(jnp.int32)


if __name__ == "__main__":
    # Module hyper-params (deterministic, in-script init)
    num_embeddings = 64
    embedding_dim = 32
    commitment_cost = 0.25

    key = jax.random.PRNGKey(0)
    k_x3, k_x4, k_e = jax.random.split(key, 3)
    embedding = jax.random.uniform(
        k_e, (num_embeddings, embedding_dim), dtype=jnp.float32,
        minval=-1.0 / num_embeddings, maxval=1.0 / num_embeddings)

    # 3-D branch: (B, C, L)
    B, L = 2, 16
    x3 = jax.random.normal(k_x3, (B, embedding_dim, L), dtype=jnp.float32)
    q3, loss3, idx3 = vector_quantizer_forward(x3, embedding, commitment_cost)
    jax.block_until_ready((q3, loss3, idx3))

    q3_r, loss3_r, idx3_r = _reference_forward(x3, embedding, commitment_cost)
    np.testing.assert_allclose(np.asarray(q3), np.asarray(q3_r),
                               rtol=1e-5, atol=1e-5)
    np.testing.assert_allclose(np.asarray(loss3), np.asarray(loss3_r),
                               rtol=1e-5, atol=1e-6)
    np.testing.assert_array_equal(np.asarray(idx3), np.asarray(idx3_r))

    # 4-D branch: (B, C, H, W)
    H = W = 8
    x4 = jax.random.normal(k_x4, (B, embedding_dim, H, W), dtype=jnp.float32)
    q4, loss4, idx4 = vector_quantizer_forward(x4, embedding, commitment_cost)
    jax.block_until_ready((q4, loss4, idx4))

    q4_r, loss4_r, idx4_r = _reference_forward(x4, embedding, commitment_cost)
    np.testing.assert_allclose(np.asarray(q4), np.asarray(q4_r),
                               rtol=1e-5, atol=1e-5)
    np.testing.assert_allclose(np.asarray(loss4), np.asarray(loss4_r),
                               rtol=1e-5, atol=1e-6)
    np.testing.assert_array_equal(np.asarray(idx4), np.asarray(idx4_r))

    print("KERNEL_OK")
</pallas_src>

<mosaic_0001>
module attributes {stable_mosaic.version = 11 : i64} {
  func.func @vq_kernel(%arg0: i32, %arg1: i32, %arg2: memref<1x32x16xf32, #tpu.memory_space<vmem>>, %arg3: memref<128x32xf32, #tpu.memory_space<vmem>>, %arg4: memref<128x1xf32, #tpu.memory_space<vmem>>, %arg5: memref<1x32x16xf32, #tpu.memory_space<vmem>>, %arg6: memref<1x1x16xi32, #tpu.memory_space<vmem>>, %arg7: memref<1x1x1x1xf32, #tpu.memory_space<vmem>>) attributes {dimension_semantics = [#tpu.dimension_semantics<parallel>, #tpu.dimension_semantics<parallel>], iteration_bounds = array<i64: 2, 1>, scalar_prefetch = 0 : i64, scratch_operands = 0 : i64, tpu.core_type = #tpu.core_type<tc>, window_params = [{transform_indices = @transform_0, window_bounds = array<i64: 1, 32, 16>}, {pipeline_mode = #tpu.pipeline_mode<synchronous>, transform_indices = @transform_1, window_bounds = array<i64: 128, 32>}, {pipeline_mode = #tpu.pipeline_mode<synchronous>, transform_indices = @transform_2, window_bounds = array<i64: 128, 1>}, {transform_indices = @transform_3, window_bounds = array<i64: 1, 32, 16>}, {transform_indices = @transform_4, window_bounds = array<i64: 1, 1, 16>}, {transform_indices = @transform_5, window_bounds = array<i64: 1, 1, 1, 1>}]} {
    %c0 = arith.constant 0 : index
    %c0_0 = arith.constant 0 : index
    %c0_1 = arith.constant 0 : index
    %0 = vector.load %arg2[%c0, %c0_0, %c0_1] : memref<1x32x16xf32, #tpu.memory_space<vmem>>, vector<1x32x16xf32>
    %1 = vector.shape_cast %0 : vector<1x32x16xf32> to vector<32x16xf32>
    %c0_2 = arith.constant 0 : index
    %c0_3 = arith.constant 0 : index
    %2 = vector.load %arg3[%c0_2, %c0_3] : memref<128x32xf32, #tpu.memory_space<vmem>>, vector<128x32xf32>
    %c0_4 = arith.constant 0 : index
    %c0_5 = arith.constant 0 : index
    %3 = vector.load %arg4[%c0_4, %c0_5] : memref<128x1xf32, #tpu.memory_space<vmem>>, vector<128x1xf32>
    %cst = arith.constant dense<0.000000e+00> : vector<128x16xf32>
    %4 = tpu.matmul %2, %1, %cst {dimension_numbers = #tpu.dot_dimension_numbers<[1], [0], [0], [1], [0, 0, 1, 1], [], []>} : vector<128x32xf32>, vector<32x16xf32>, vector<128x16xf32> -> vector<128x16xf32>
    %5 = vector.broadcast %3 : vector<128x1xf32> to vector<128x16xf32>
    %6 = arith.subf %4, %5 : vector<128x16xf32>
    %cst_6 = arith.constant dense<0xFF800000> : vector<16xf32>
    %7 = vector.multi_reduction <maximumf>, %6, %cst_6 [0] : vector<128x16xf32> to vector<16xf32>
    %8 = vector.shape_cast %7 : vector<16xf32> to vector<1x16xf32>
    %9 = tpu.iota {dimensions = array<i32: 0>} : vector<128x16xi32>
    %10 = arith.sitofp %9 : vector<128x16xi32> to vector<128x16xf32>
    %11 = vector.broadcast %8 : vector<1x16xf32> to vector<128x16xf32>
    %12 = arith.cmpf oge, %6, %11 : vector<128x16xf32>
    %cst_7 = arith.constant 1.280000e+02 : f32
    %13 = vector.broadcast %cst_7 : f32 to vector<128x16xf32>
    %14 = arith.select %12, %10, %13 : vector<128x16xi1>, vector<128x16xf32>
    %cst_8 = arith.constant dense<0x7F800000> : vector<16xf32>
    %15 = vector.multi_reduction <minimumf>, %14, %cst_8 [0] : vector<128x16xf32> to vector<16xf32>
    %16 = vector.shape_cast %15 : vector<16xf32> to vector<1x16xf32>
    %17 = arith.fptosi %16 : vector<1x16xf32> to vector<1x16xi32>
    %c0_9 = arith.constant 0 : index
    %c0_10 = arith.constant 0 : index
    %c0_11 = arith.constant 0 : index
    %18 = vector.load %arg6[%c0_9, %c0_10, %c0_11] : memref<1x1x16xi32, #tpu.memory_space<vmem>>, vector<1x1x16xi32>
    %19 = vector.shape_cast %18 : vector<1x1x16xi32> to vector<1x16xi32>
    %20 = vector.shape_cast %17 : vector<1x16xi32> to vector<1x1x16xi32>
    tpu.vector_store %arg6[%c0_9, %c0_10, %c0_11], %20 {strides = array<i32>} : memref<1x1x16xi32, #tpu.memory_space<vmem>>, vector<1x1x16xi32>,
    %21 = vector.broadcast %16 : vector<1x16xf32> to vector<128x16xf32>
    %22 = arith.cmpf oeq, %10, %21 : vector<128x16xf32>
    %23 = arith.extui %22 : vector<128x16xi1> to vector<128x16xi32>
    %24 = arith.sitofp %23 : vector<128x16xi32> to vector<128x16xf32>
    %cst_12 = arith.constant dense<0.000000e+00> : vector<32x16xf32>
    %25 = tpu.matmul %2, %24, %cst_12 {dimension_numbers = #tpu.dot_dimension_numbers<[0], [0], [1], [1], [0, 1, 1, 1], [], []>} : vector<128x32xf32>, vector<128x16xf32>, vector<32x16xf32> -> vector<32x16xf32>
    %c0_13 = arith.constant 0 : index
    %c0_14 = arith.constant 0 : index
    %c0_15 = arith.constant 0 : index
    %26 = vector.load %arg5[%c0_13, %c0_14, %c0_15] : memref<1x32x16xf32, #tpu.memory_space<vmem>>, vector<1x32x16xf32>
    %27 = vector.shape_cast %26 : vector<1x32x16xf32> to vector<32x16xf32>
    %28 = vector.shape_cast %25 : vector<32x16xf32> to vector<1x32x16xf32>
    tpu.vector_store %arg5[%c0_13, %c0_14, %c0_15], %28 {strides = array<i32>} : memref<1x32x16xf32, #tpu.memory_space<vmem>>, vector<1x32x16xf32>,
    %29 = arith.subf %25, %1 : vector<32x16xf32>
    %30 = arith.mulf %29, %29 : vector<32x16xf32>
    %31 = vector.shape_cast %30 : vector<32x16xf32> to vector<1x32x16xf32>
    %cst_16 = arith.constant dense<0.000000e+00> : vector<1xf32>
    %32 = vector.multi_reduction <add>, %31, %cst_16 [1, 2] : vector<1x32x16xf32> to vector<1xf32>
    %33 = vector.shape_cast %32 : vector<1xf32> to vector<1x1x1xf32>
    %34 = vector.extract %33[0, 0, 0] : f32 from vector<1x1x1xf32>
    %35 = vector.broadcast %34 : f32 to vector<1x1x1x1xf32>
    %c0_17 = arith.constant 0 : index
    %c0_18 = arith.constant 0 : index
    %c0_19 = arith.constant 0 : index
    %c0_20 = arith.constant 0 : index
    %36 = vector.load %arg7[%c0_17, %c0_18, %c0_19, %c0_20] : memref<1x1x1x1xf32, #tpu.memory_space<vmem>>, vector<1x1x1x1xf32>
    tpu.vector_store %arg7[%c0_17, %c0_18, %c0_19, %c0_20], %35 {strides = array<i32>} : memref<1x1x1x1xf32, #tpu.memory_space<vmem>>, vector<1x1x1x1xf32>,
    return
  }
  func.func @transform_0(%arg0: i32, %arg1: i32) -> (i32, i32, i32) {
    %c0_i32 = arith.constant 0 : i32
    %c0_i32_0 = arith.constant 0 : i32
    return %arg0, %c0_i32, %arg1 : i32, i32, i32
  }
  func.func @transform_1(%arg0: i32, %arg1: i32) -> (i32, i32) {
    %c0_i32 = arith.constant 0 : i32
    %c0_i32_0 = arith.constant 0 : i32
    %c0_i32_1 = arith.constant 0 : i32
    return %c0_i32, %c0_i32_0 : i32, i32
  }
  func.func @transform_2(%arg0: i32, %arg1: i32) -> (i32, i32) {
    %c0_i32 = arith.constant 0 : i32
    %c0_i32_0 = arith.constant 0 : i32
    %c0_i32_1 = arith.constant 0 : i32
    return %c0_i32, %c0_i32_0 : i32, i32
  }
  func.func @transform_3(%arg0: i32, %arg1: i32) -> (i32, i32, i32) {
    %c0_i32 = arith.constant 0 : i32
    %c0_i32_0 = arith.constant 0 : i32
    return %arg0, %c0_i32, %arg1 : i32, i32, i32
  }
  func.func @transform_4(%arg0: i32, %arg1: i32) -> (i32, i32, i32) {
    %c0_i32 = arith.constant 0 : i32
    %c0_i32_0 = arith.constant 0 : i32
    return %arg0, %c0_i32, %arg1 : i32, i32, i32
  }
  func.func @transform_5(%arg0: i32, %arg1: i32) -> (i32, i32, i32, i32) {
    %c0_i32 = arith.constant 0 : i32
    %c0_i32_0 = arith.constant 0 : i32
    %c0_i32_1 = arith.constant 0 : i32
    return %arg0, %arg1, %c0_i32, %c0_i32_0 : i32, i32, i32, i32
  }
}

module attributes {stable_mosaic.version = 11 : i64} {
  func.func @vq_kernel(%arg0: i32, %arg1: i32, %arg2: memref<1x32x16xf32, #tpu.memory_space<vmem>>, %arg3: memref<128x32xf32, #tpu.memory_space<vmem>>, %arg4: memref<128x1xf32, #tpu.memory_space<vmem>>, %arg5: memref<1x32x16xf32, #tpu.memory_space<vmem>>, %arg6: memref<1x1x16xi32, #tpu.memory_space<vmem>>, %arg7: memref<1x1x1x1xf32, #tpu.memory_space<vmem>>) attributes {dimension_semantics = [#tpu.dimension_semantics<parallel>, #tpu.dimension_semantics<parallel>], iteration_bounds = array<i64: 2, 1>, scalar_prefetch = 0 : i64, scratch_operands = 0 : i64, tpu.core_type = #tpu.core_type<tc>, window_params = [{transform_indices = @transform_0, window_bounds = array<i64: 1, 32, 16>}, {pipeline_mode = #tpu.pipeline_mode<synchronous>, transform_indices = @transform_1, window_bounds = array<i64: 128, 32>}, {pipeline_mode = #tpu.pipeline_mode<synchronous>, transform_indices = @transform_2, window_bounds = array<i64: 128, 1>}, {transform_indices = @transform_3, window_bounds = array<i64: 1, 32, 16>}, {transform_indices = @transform_4, window_bounds = array<i64: 1, 1, 16>}, {transform_indices = @transform_5, window_bounds = array<i64: 1, 1, 1, 1>}]} {
    %c0 = arith.constant 0 : index
    %c0_0 = arith.constant 0 : index
    %c0_1 = arith.constant 0 : index
    %0 = vector.load %arg2[%c0, %c0_0, %c0_1] : memref<1x32x16xf32, #tpu.memory_space<vmem>>, vector<1x32x16xf32>
    %1 = vector.shape_cast %0 : vector<1x32x16xf32> to vector<32x16xf32>
    %c0_2 = arith.constant 0 : index
    %c0_3 = arith.constant 0 : index
    %2 = vector.load %arg3[%c0_2, %c0_3] : memref<128x32xf32, #tpu.memory_space<vmem>>, vector<128x32xf32>
    %c0_4 = arith.constant 0 : index
    %c0_5 = arith.constant 0 : index
    %3 = vector.load %arg4[%c0_4, %c0_5] : memref<128x1xf32, #tpu.memory_space<vmem>>, vector<128x1xf32>
    %cst = arith.constant dense<0.000000e+00> : vector<128x16xf32>
    %4 = tpu.matmul %2, %1, %cst {dimension_numbers = #tpu.dot_dimension_numbers<[1], [0], [0], [1], [0, 0, 1, 1], [], []>} : vector<128x32xf32>, vector<32x16xf32>, vector<128x16xf32> -> vector<128x16xf32>
    %5 = vector.broadcast %3 : vector<128x1xf32> to vector<128x16xf32>
    %6 = arith.subf %4, %5 : vector<128x16xf32>
    %cst_6 = arith.constant dense<0xFF800000> : vector<16xf32>
    %7 = vector.multi_reduction <maximumf>, %6, %cst_6 [0] : vector<128x16xf32> to vector<16xf32>
    %8 = vector.shape_cast %7 : vector<16xf32> to vector<1x16xf32>
    %9 = tpu.iota {dimensions = array<i32: 0>} : vector<128x16xi32>
    %10 = arith.sitofp %9 : vector<128x16xi32> to vector<128x16xf32>
    %11 = vector.broadcast %8 : vector<1x16xf32> to vector<128x16xf32>
    %12 = arith.cmpf oge, %6, %11 : vector<128x16xf32>
    %cst_7 = arith.constant 1.280000e+02 : f32
    %13 = vector.broadcast %cst_7 : f32 to vector<128x16xf32>
    %14 = arith.select %12, %10, %13 : vector<128x16xi1>, vector<128x16xf32>
    %cst_8 = arith.constant dense<0x7F800000> : vector<16xf32>
    %15 = vector.multi_reduction <minimumf>, %14, %cst_8 [0] : vector<128x16xf32> to vector<16xf32>
    %16 = vector.shape_cast %15 : vector<16xf32> to vector<1x16xf32>
    %17 = arith.fptosi %16 : vector<1x16xf32> to vector<1x16xi32>
    %c0_9 = arith.constant 0 : index
    %c0_10 = arith.constant 0 : index
    %c0_11 = arith.constant 0 : index
    %18 = vector.load %arg6[%c0_9, %c0_10, %c0_11] : memref<1x1x16xi32, #tpu.memory_space<vmem>>, vector<1x1x16xi32>
    %19 = vector.shape_cast %18 : vector<1x1x16xi32> to vector<1x16xi32>
    %20 = vector.shape_cast %17 : vector<1x16xi32> to vector<1x1x16xi32>
    tpu.vector_store %arg6[%c0_9, %c0_10, %c0_11], %20 {strides = array<i32>} : memref<1x1x16xi32, #tpu.memory_space<vmem>>, vector<1x1x16xi32>,
    %21 = vector.broadcast %16 : vector<1x16xf32> to vector<128x16xf32>
    %22 = arith.cmpf oeq, %10, %21 : vector<128x16xf32>
    %23 = arith.extui %22 : vector<128x16xi1> to vector<128x16xi32>
    %24 = arith.sitofp %23 : vector<128x16xi32> to vector<128x16xf32>
    %cst_12 = arith.constant dense<0.000000e+00> : vector<32x16xf32>
    %25 = tpu.matmul %2, %24, %cst_12 {dimension_numbers = #tpu.dot_dimension_numbers<[0], [0], [1], [1], [0, 1, 1, 1], [], []>} : vector<128x32xf32>, vector<128x16xf32>, vector<32x16xf32> -> vector<32x16xf32>
    %c0_13 = arith.constant 0 : index
    %c0_14 = arith.constant 0 : index
    %c0_15 = arith.constant 0 : index
    %26 = vector.load %arg5[%c0_13, %c0_14, %c0_15] : memref<1x32x16xf32, #tpu.memory_space<vmem>>, vector<1x32x16xf32>
    %27 = vector.shape_cast %26 : vector<1x32x16xf32> to vector<32x16xf32>
    %28 = vector.shape_cast %25 : vector<32x16xf32> to vector<1x32x16xf32>
    tpu.vector_store %arg5[%c0_13, %c0_14, %c0_15], %28 {strides = array<i32>} : memref<1x32x16xf32, #tpu.memory_space<vmem>>, vector<1x32x16xf32>,
    %29 = arith.subf %25, %1 : vector<32x16xf32>
    %30 = arith.mulf %29, %29 : vector<32x16xf32>
    %31 = vector.shape_cast %30 : vector<32x16xf32> to vector<1x32x16xf32>
    %cst_16 = arith.constant dense<0.000000e+00> : vector<1xf32>
    %32 = vector.multi_reduction <add>, %31, %cst_16 [1, 2] : vector<1x32x16xf32> to vector<1xf32>
    %33 = vector.shape_cast %32 : vector<1xf32> to vector<1x1x1xf32>
    %34 = vector.extract %33[0, 0, 0] : f32 from vector<1x1x1xf32>
    %35 = vector.broadcast %34 : f32 to vector<1x1x1x1xf32>
    %c0_17 = arith.constant 0 : index
    %c0_18 = arith.constant 0 : index
    %c0_19 = arith.constant 0 : index
    %c0_20 = arith.constant 0 : index
    %36 = vector.load %arg7[%c0_17, %c0_18, %c0_19, %c0_20] : memref<1x1x1x1xf32, #tpu.memory_space<vmem>>, vector<1x1x1x1xf32>
    tpu.vector_store %arg7[%c0_17, %c0_18, %c0_19, %c0_20], %35 {strides = array<i32>} : memref<1x1x1x1xf32, #tpu.memory_space<vmem>>, vector<1x1x1x1xf32>,
    return
  }
  func.func @transform_0(%arg0: i32, %arg1: i32) -> (i32, i32, i32) {
    %c0_i32 = arith.constant 0 : i32
    %c0_i32_0 = arith.constant 0 : i32
    return %arg0, %c0_i32, %arg1 : i32, i32, i32
  }
  func.func @transform_1(%arg0: i32, %arg1: i32) -> (i32, i32) {
    %c0_i32 = arith.constant 0 : i32
    %c0_i32_0 = arith.constant 0 : i32
    %c0_i32_1 = arith.constant 0 : i32
    return %c0_i32, %c0_i32_0 : i32, i32
  }
  func.func @transform_2(%arg0: i32, %arg1: i32) -> (i32, i32) {
    %c0_i32 = arith.constant 0 : i32
    %c0_i32_0 = arith.constant 0 : i32
    %c0_i32_1 = arith.constant 0 : i32
    return %c0_i32, %c0_i32_0 : i32, i32
  }
  func.func @transform_3(%arg0: i32, %arg1: i32) -> (i32, i32, i32) {
    %c0_i32 = arith.constant 0 : i32
    %c0_i32_0 = arith.constant 0 : i32
    return %arg0, %c0_i32, %arg1 : i32, i32, i32
  }
  func.func @transform_4(%arg0: i32, %arg1: i32) -> (i32, i32, i32) {
    %c0_i32 = arith.constant 0 : i32
    %c0_i32_0 = arith.constant 0 : i32
    return %arg0, %c0_i32, %arg1 : i32, i32, i32
  }
  func.func @transform_5(%arg0: i32, %arg1: i32) -> (i32, i32, i32, i32) {
    %c0_i32 = arith.constant 0 : i32
    %c0_i32_0 = arith.constant 0 : i32
    %c0_i32_1 = arith.constant 0 : i32
    return %arg0, %arg1, %c0_i32, %c0_i32_0 : i32, i32, i32, i32
  }
}

</mosaic_0001>

<bundles_post_ra>
// kernel: tpu_custom_call.1
= control target key start
LH: loop header
LB: loop body
LE: loop exit
PB: predicated region body
PF: predicated region fallthrough
CT: control target
= control target key end

     0   :  { %11 = vsyncpa [#allocation3], 0  ;;  %s1944_s0 = inlined_call_operand.vmem [shape: f32[2,32,16], index: 0, kind: input, shape index: {}]   ;;  %s1945_s1 = inlined_call_operand.vmem [shape: f32[128,32], index: 1, kind: input, shape index: {}]   ;;  %s1946_s2 = inlined_call_operand.vmem [shape: f32[128,1], index: 2, kind: input, shape index: {}]   ;;  %s1947_s3 = inlined_call_operand.vmem [shape: f32[2,32,16], index: 3, kind: output, shape index: {0}]   ;;  %s1948_s4 = inlined_call_operand.hbm [shape: s32[2,1,16], index: 4, kind: output, shape index: {1}]   ;;  %s1949_s5 = inlined_call_operand.vmem [shape: f32[2,1,1,1], index: 5, kind: output, shape index: {2}]  }
   0x1   :  { %13 = vsyncpa [#allocation3 + $0x1], 0  ;;  %s1461_s18 = smov 0   ;;  %s1463_s19 = smov 0  }
   0x2   :  { %s1465_s20 = smov 0   ;;  %s1467_s21 = smov 0  }
   0x3   :  { %s1469_s22 = smov 0   ;;  %s1471_s23 = smov 0  }
   0x4 LB: > { %s1115_s24 = sadd.s32 4294967295, %s1426_s23   ;;  %s1116_s25 = sadd.s32 4294967294, %s1426_s23   ;;  %s1426_s23 = sphi %s1471_s23, %s19_s23   ;;  %s1422_s22 = sphi %s1469_s22, %s1956_s22   ;;  %s1418_s21 = sphi %s1467_s21, %s1955_s21   ;;  %s1414_s20 = sphi %s1465_s20, %s1954_s20   ;;  %s1410_s19 = sphi %s1463_s19, %s1953_s19   ;;  %s1406_s18 = sphi %s1461_s18, %s1952_s18  }
   0x5   : > { %s31_s26 = sadd.s32 1, %s1422_s22  ;;  %s138_s27 = sadd.s32 1, %s1414_s20 }
   0x6   : > { %p33_p0 = scmp.ge.s32.totalorder %s31_s26, 2  ;;  %p148_p1 = scmp.ne.s32.totalorder %s1414_s20, %s1410_s19 }
   0x7   : > { %p149_p2 = scmp.eq.s32.totalorder %s1115_s24, 1  ;;  %p154_p3 = scmp.ne.s32.totalorder %s1410_s19, %s1406_s18 }
   0x8   : > { %s1958_s26 = smov (%p33_p0, %s31_s26), 0  ;;  %p155_p5 = scmp.eq.s32.totalorder %s1116_s25, 1 }
   0x9   : > { %p1501_p4 = por %p149_p2, %p148_p1  ;;  %s133_s29 = ssub.s32 %s1422_s22, %s1958_s26 }
   0xa   : > { %p1119_p6 = scmp.ge.s32.totalorder %s1426_s23, 1  ;;  %p136_p7 = scmp.eq.s32.totalorder %s133_s29, 0 }
   0xb   : > { %p1508_p8 = por %p155_p5, %p154_p3  ;;  %p218_p9 = scmp.lt.s32.totalorder %s1426_s23, 3 }
   0xc   : > { %s1514_s6 = scalar_select %p136_p7, %s1414_s20, %s138_s27  }
   0xd   : > { %p219_p10 = pnand %p1119_p6, %p218_p9 }
   0xe   : > { %p262_p11 = scmp.lt.s32.totalorder (!%p219_p10), %s1418_s21, 1  ;;  %s252_s11 = sand.u32 (!%p219_p10), 1, %s1410_s19  }
   0xf   : > { %222 = sbr.rel (%p219_p10) target bundleno = 754 (0x2f2), region = 32  ;;  %s1857_s12 = scalar_lea.vmem (!%p219_p10), [#allocation2], %s252_s11 }
  0x10   : > { %s980_s25 = sshll.u32 (!%p219_p10), %s1857_s12, 4  ;;  %s958_s27 = scalar_lea.sflag (!%p219_p10), [#allocation3], %s252_s11  ;;  %s981_s25 = int_to_ptr.vmem [resolvable:$true] %s980_s25 }
  0x11   : > { %s1350_s29 = scalar_lea.vmem (!%p219_p10), %s981_s25, 16  ;;  %s1430_s7 = smov (!%p219_p10), [#allocation2]  }
  0x12   : > { %p1351_p12 = scmp.ne.s32.totalorder (!%p219_p10), %s981_s25, %s1350_s29  ;;  %s1354_s8 = sshll.u32 (!%p219_p10), %s1430_s7, 4  ;;  %s1355_s8 = int_to_ptr.vmem [resolvable:$false] %s1354_s8 }
  0x13   : > { %s1356_s14 = scalar_lea.vmem (!%p219_p10), %s1355_s8, 32  ;;  %p1357_p1 = scmp.lt.s32.totalorder (!%p219_p10), %s981_s25, %s1355_s8 }
  0x14   : > { %v1520_v0 = vld [vmem:[%s1945_s1] sm:$0xff]  ;;  %vm320_vm0 = vcmask 261120   ;;  %v1428_v1 = vmov 0   ;;  %s1525_s9 = scalar_select %p262_p11, %s1418_s21, 1  ;;  %v306_v2 = vld [vmem:[%s1946_s2 + $0x10] sm:$0xff]  ;;  %v307_v6 = vld [vmem:[%s1946_s2 + $0x18] sm:$0xff] }
  0x15   : > { %1225 = vmatprep.mubr.msk.f32.mxu0 %vm320_vm0, %v1520_v0  ;;  %1349 = vset.pattern.permute.xlu1 %v1428_v1  ;;  %v304_v3 = vld [vmem:[%s1946_s2] sm:$0xff]  ;;  %v305_v8 = vld [vmem:[%s1946_s2 + $0x8] sm:$0xff]  ;;  %v290_v13 = vld [vmem:[%s1945_s1 + $0x10] sm:$0xff]  ;;  %vm610_vm1 = vcmask 130048   ;;  %p1352_p13 = pnand %p1351_p12, %p1501_p4  ;;  %p1358_p2 = scmp.lt.s32.totalorder %s1356_s14, %s1350_s29 }
  0x16   : > { %1348 = vset.pattern.permute.xlu0 %v1428_v1  ;;  %s1175_s10 = sshll.u32 %s1525_s9, 5  ;;  %526 = vperm.xlu1 %1349, %v306_v2   ;;  %v309_v10 = vld [vmem:[%s1946_s2 + $0x28] sm:$0xff]  ;;  %v308_v12 = vld [vmem:[%s1946_s2 + $0x20] sm:$0xff]  ;;  %v311_v14 = vld [vmem:[%s1946_s2 + $0x38] sm:$0xff] }
  0x17   : > { %s269_s13 = scalar_lea.vmem %s1944_s0, %s1175_s10  ;;  %516 = vperm.xlu0 %1348, %v304_v3   ;;  %v289_v11 = vld [vmem:[%s1945_s1 + $0x8] sm:$0xff]  ;;  %v291_v15 = vld [vmem:[%s1945_s1 + $0x18] sm:$0xff]  ;;  %v310_v16 = vld [vmem:[%s1946_s2 + $0x30] sm:$0xff]  ;;  %p1353_p0 = pneg %p1352_p13 }
  0x18   : > { %v1539_v4 = vld [vmem:[%s269_s13 + $0x18] sm:$0xff]  ;;  %v1541_v5 = vld [vmem:[%s269_s13 + $0x10] sm:$0xff]  ;;  %v1548_v7 = vld [vmem:[%s269_s13 + $0x8] sm:$0xff]  ;;  %p1359_p3 = por %p1358_p2, %p1357_p1 }
  0x19   : > { %1217 = vmatprep.subr.mxu0 %v1539_v4  ;;  %v1555_v9 = vld [vmem:[%s269_s13] sm:$0xff]  ;;  %v313_v18 = vld [vmem:[%s1946_s2 + $0x48] sm:$0xff]  ;;  %v294_v21 = vld [vmem:[%s1945_s1 + $0x30] sm:$0xff]  ;;  %s277_s13 = scalar_lea.vmem %s1947_s3, %s1175_s10  ;;  %s1172_s10 = sshll.u32 %s1418_s21, 4 }
  0x1a   : > { %1218 = vmatpush3.msra.mxu0 %v1539_v4  ;;  %531 = vperm.xlu1 %1349, %v307_v6   ;;  %v292_v17 = vld [vmem:[%s1945_s1 + $0x20] sm:$0xff]  ;;  %v293_v19 = vld [vmem:[%s1945_s1 + $0x28] sm:$0xff]  ;;  %v315_v22 = vld [vmem:[%s1946_s2 + $0x58] sm:$0xff]  ;;  %s978_s24 = scalar_lea.hbm %s1948_s4, %s1172_s10  ;;  %p1360_p5 = pnand %p1359_p3, %p1353_p0 }
  0x1b   : > { %1219 = vmatprep.subr.mxu0 %v1541_v5  ;;  %521 = vperm.xlu0 %1348, %v305_v8   ;;  %v312_v20 = vld [vmem:[%s1946_s2 + $0x40] sm:$0xff]  ;;  %v295_v23 = vld [vmem:[%s1945_s1 + $0x38] sm:$0xff]  ;;  %v314_v24 = vld [vmem:[%s1946_s2 + $0x50] sm:$0xff] }
  0x1c   : > { %1220 = vmatpush3.msra.mxu0 %v1541_v5  ;;  %v296_v25 = vld [vmem:[%s1945_s1 + $0x40] sm:$0xff]  ;;  %v317_v26 = vld [vmem:[%s1946_s2 + $0x68] sm:$0xff]  ;;  %v298_v29 = vld [vmem:[%s1945_s1 + $0x50] sm:$0xff] }
  0x1d   : > { %1221 = vmatprep.subr.mxu0 %v1548_v7  ;;  %v297_v27 = vld [vmem:[%s1945_s1 + $0x48] sm:$0xff]  ;;  %v316_v28 = vld [vmem:[%s1946_s2 + $0x60] sm:$0xff]  ;;  %v319_v30 = vld [vmem:[%s1946_s2 + $0x78] sm:$0xff] }
  0x1e   : > { %1222 = vmatpush3.msra.mxu0 %v1548_v7  ;;  %541 = vperm.xlu1 %1349, %v309_v10   ;;  %v299_v31 = vld [vmem:[%s1945_s1 + $0x58] sm:$0xff]  ;;  %v318_v32 = vld [vmem:[%s1946_s2 + $0x70] sm:$0xff]  ;;  %v300_v33 = vld [vmem:[%s1945_s1 + $0x60] sm:$0xff] }
  0x1f   : > { %1223 = vmatprep.subr.mxu0 %v1555_v9  ;;  %536 = vperm.xlu0 %1348, %v308_v12   ;;  %v301_v34 = vld [vmem:[%s1945_s1 + $0x68] sm:$0xff]  ;;  %v302_v35 = vld [vmem:[%s1945_s1 + $0x70] sm:$0xff]  ;;  %v303_v36 = vld [vmem:[%s1945_s1 + $0x78] sm:$0xff] }
  0x20   : > { %1224 = vmatpush3.msra.mxu0 %v1555_v9 }
  0x21   : > { %1226 = vmatmul.mubr.msk.f32.vlgmr.msra.gmra.mxu0 %vm320_vm0, %v289_v11 }
  0x22   : > { %1228 = vmatprep.mubr.msk.f32.mxu0 %vm320_vm0, %v290_v13  ;;  %551 = vperm.xlu1 %1349, %v311_v14  }
  0x23   : > { %546 = vperm.xlu0 %1348, %v310_v16  }
  0x25   : > { %1229 = vmatmul.mubr.msk.f32.gmra.mxu0 %vm320_vm0, %v291_v15 }
  0x26   : > { %1231 = vmatprep.mubr.msk.f32.mxu0 %vm320_vm0, %v292_v17  ;;  %561 = vperm.xlu1 %1349, %v313_v18  }
  0x27   : > { %556 = vperm.xlu0 %1348, %v312_v20  }
  0x29   : > { %1232 = vmatmul.mubr.msk.f32.gmra.mxu0 %vm320_vm0, %v293_v19 }
  0x2a   : > { %1234 = vmatprep.mubr.msk.f32.mxu0 %vm320_vm0, %v294_v21  ;;  %571 = vperm.xlu1 %1349, %v315_v22  }
  0x2b   : > { %566 = vperm.xlu0 %1348, %v314_v24  }
  0x2d   : > { %1235 = vmatmul.mubr.msk.f32.gmra.mxu0 %vm320_vm0, %v295_v23 }
  0x2e   : > { %1237 = vmatprep.mubr.msk.f32.mxu0 %vm320_vm0, %v296_v25  ;;  %581 = vperm.xlu1 %1349, %v317_v26  }
  0x2f   : > { %576 = vperm.xlu0 %1348, %v316_v28  }
  0x31   : > { %1238 = vmatmul.mubr.msk.f32.gmra.mxu0 %vm320_vm0, %v297_v27 }
  0x32   : > { %1240 = vmatprep.mubr.msk.f32.mxu0 %vm320_vm0, %v298_v29  ;;  %591 = vperm.xlu1 %1349, %v319_v30  }
  0x33   : > { %586 = vperm.xlu0 %1348, %v318_v32  }
  0x35   : > { %1241 = vmatmul.mubr.msk.f32.gmra.mxu0 %vm320_vm0, %v299_v31 }
  0x36   : > { %1243 = vmatprep.mubr.msk.f32.mxu0 %vm320_vm0, %v300_v33 }
  0x39   : > { %1244 = vmatmul.mubr.msk.f32.gmra.mxu0 %vm320_vm0, %v301_v34 }
  0x3a   : > { %1246 = vmatprep.mubr.msk.f32.mxu0 %vm320_vm0, %v302_v35 }
  0x3d   : > { %1247 = vmatmul.mubr.msk.f32.gmra.mxu0 %vm320_vm0, %v303_v36 }
  0x51   : > { %801 = vxpose.xlu0.b32.start [1/16] (narrow) %v1520_v0, 32 }
  0x55   : > { %802 = vxpose.xlu0.b32.cont [2/16] (narrow) %v289_v11, 32 }
  0x59   : > { %803 = vxpose.xlu0.b32.cont [3/16] (narrow) %v290_v13, 32 }
  0x5d   : > { %804 = vxpose.xlu0.b32.cont [4/16] (narrow) %v291_v15, 32 }
  0x61   : > { %805 = vxpose.xlu0.b32.cont [5/16] (narrow) %v292_v17, 32 }
  0x65   : > { %806 = vxpose.xlu0.b32.cont [6/16] (narrow) %v293_v19, 32 }
  0x69   : > { %807 = vxpose.xlu0.b32.cont [7/16] (narrow) %v294_v21, 32 }
  0x6d   : > { %808 = vxpose.xlu0.b32.cont [8/16] (narrow) %v295_v23, 32 }
  0x71   : > { %809 = vxpose.xlu0.b32.cont [9/16] (narrow) %v296_v25, 32 }
  0x75   : > { %810 = vxpose.xlu0.b32.cont [10/16] (narrow) %v297_v27, 32 }
  0x79   : > { %811 = vxpose.xlu0.b32.cont [11/16] (narrow) %v298_v29, 32 }
  0x7d   : > { %812 = vxpose.xlu0.b32.cont [12/16] (narrow) %v299_v31, 32 }
  0x81   : > { %813 = vxpose.xlu0.b32.cont [13/16] (narrow) %v300_v33, 32 }
  0x85   : > { %814 = vxpose.xlu0.b32.cont [14/16] (narrow) %v301_v34, 32 }
  0x89   : > { %815 = vxpose.xlu0.b32.cont [15/16] (narrow) %v302_v35, 32 }
  0x8d   : > { %816 = vxpose.xlu0.b32.end [16/16] (narrow) %v303_v36, 32 }
  0x91   : > { %v527_v46 = vpop.permute.xlu1 %526 }
  0x92   : > { %v517_v37 = vpop.permute.xlu0 %516 }
  0x95   : > { %v532_v47 = vpop.permute.xlu1 %531 }
  0x96   : > { %v522_v38 = vpop.permute.xlu0 %521 }
  0x99   : > { %v542_v48 = vpop.permute.xlu1 %541 }
  0x9a   : > { %v537_v39 = vpop.permute.xlu0 %536 }
  0x9d   : > { %v552_v51 = vpop.permute.xlu1 %551 }
  0x9e   : > { %v547_v40 = vpop.permute.xlu0 %546 }
  0xa1   : > { %v562_v55 = vpop.permute.xlu1 %561 }
  0xa2   : > { %v557_v41 = vpop.permute.xlu0 %556 }
  0xa5   : > { %v572_v59 = vpop.permute.xlu1 %571 }
  0xa6   : > { %v567_v42 = vpop.permute.xlu0 %566 }
  0xa9   : > { %v582_v0 = vpop.permute.xlu1 %581 }
  0xaa   : > { %v577_v43 = vpop.permute.xlu0 %576 }
  0xad   : > { %v592_v28 = vpop.permute.xlu1 %591 }
  0xae   : > { %v1658_v44 = vpop.permute.xlu0 %586 }
  0xcd   : > { %v817_v45 = vpop.trf.xlu0 }
  0xce   : > { %1281 = vmatprep.mubr.f32.mxu1 %v817_v45 }
  0xe1   : > { %v1227_v49 = vpop.f32.mrf.mxu0 }
  0xe2   : > { %v1662_v1 = vsub.f32 %v1227_v49, %v522_v38 }
  0xe3   : > { %v435_v50 = vpop.f32.mrf.mxu0 }
  0xe4   : > { %v1664_v2 = vsub.f32 %v435_v50, %v517_v37  ;;  %v612_v19 = vsel %vm610_vm1, %v1662_v1, -inf }
  0xe5   : > { %v1230_v52 = vpop.f32.mrf.mxu0 }
  0xe6   : > { %v1674_v12 = vsub.f32 %v1230_v52, %v532_v47  ;;  %v611_v20 = vsel %vm610_vm1, %v1664_v2, -inf }
  0xe7   : > { %v445_v53 = vpop.f32.mrf.mxu0 }
  0xe8   : > { %v1676_v13 = vsub.f32 %v445_v53, %v527_v46  ;;  %v614_v29 = vsel %vm610_vm1, %v1674_v12, -inf }
  0xe9   : > { %v1233_v54 = vpop.f32.mrf.mxu0 }
  0xea   : > { %v1666_v3 = vsub.f32 %v1233_v54, %v542_v48  ;;  %v613_v30 = vsel %vm610_vm1, %v1676_v13, -inf }
  0xeb   : > { %v455_v56 = vpop.f32.mrf.mxu0 }
  0xec   : > { %v1660_v63 = vsub.f32 %v455_v56, %v537_v39  ;;  %v617_v21 = vsel %vm610_vm1, %v1666_v3, -inf }
  0xed   : > { %v1236_v57 = vpop.f32.mrf.mxu0  ;;  %v618_v38 = vmax.f32 %v612_v19, %v617_v21 }
  0xee   : > { %v1668_v6 = vsub.f32 %v1236_v57, %v552_v51  ;;  %v615_v16 = vsel %vm610_vm1, %v1660_v63, -inf }
  0xef   : > { %v465_v58 = vpop.f32.mrf.mxu0  ;;  %v616_v31 = vmax.f32 %v611_v20, %v615_v16 }
  0xf0   : > { %v1670_v10 = vsub.f32 %v465_v58, %v547_v40  ;;  %v621_v22 = vsel %vm610_vm1, %v1668_v6, -inf }
  0xf1   : > { %v1239_v60 = vpop.f32.mrf.mxu0  ;;  %v622_v39 = vmax.f32 %v614_v29, %v621_v22 }
  0xf2   : > { %v1678_v14 = vsub.f32 %v1239_v60, %v562_v55  ;;  %v619_v24 = vsel %vm610_vm1, %v1670_v10, -inf  ;;  %v648_v55 = vlaneseq }
  0xf3   : > { %v475_v61 = vpop.f32.mrf.mxu0  ;;  %v620_v40 = vmax.f32 %v613_v30, %v619_v24 }
  0xf4   : > { %v1672_v11 = vsub.f32 %v475_v61, %v557_v41  ;;  %v625_v32 = vsel %vm610_vm1, %v1678_v14, -inf }
  0xf5   : > { %v1242_v62 = vpop.f32.mrf.mxu0  ;;  %v626_v47 = vmax.f32 %v618_v38, %v625_v32 }
  0xf6   : > { %v1682_v17 = vsub.f32 %v1242_v62, %v572_v59  ;;  %v623_v25 = vsel %vm610_vm1, %v1672_v11, -inf  ;;  %v1722_v59 = vshrl.u32 %v648_v55, 7 }
  0xf7   : > { %v485_v8 = vpop.f32.mrf.mxu0  ;;  %v624_v41 = vmax.f32 %v616_v31, %v623_v25 }
  0xf8   : > { %v1684_v18 = vsub.f32 %v485_v8, %v567_v42  ;;  %v629_v34 = vsel %vm610_vm1, %v1682_v17, -inf  ;;  %v1725_v62 = vadd.s32 16, %v1722_v59  ;;  %v1731_v8 = vadd.s32 80, %v1722_v59 }
  0xf9   : > { %v1245_v15 = vpop.f32.mrf.mxu0  ;;  %v630_v48 = vmax.f32 %v622_v39, %v629_v34  ;;  %v1737_v16 = vadd.s32 8, %v1722_v59  ;;  %v1740_v19 = vadd.s32 24, %v1722_v59  ;;  %v1743_v20 = vadd.s32 32, %v1722_v59 }
  0xfa   : > { %v1698_v26 = vsub.f32 %v1245_v15, %v582_v0  ;;  %v627_v35 = vsel %vm610_vm1, %v1684_v18, -inf  ;;  %v1734_v15 = vadd.s32 112, %v1722_v59  ;;  %v1746_v21 = vadd.s32 40, %v1722_v59 }
  0xfb   : > { %v495_v23 = vpop.f32.mrf.mxu0  ;;  %v628_v49 = vmax.f32 %v620_v40, %v627_v35  ;;  %v1751_v25 = vadd.s32 56, %v1722_v59  ;;  %v1757_v29 = vadd.s32 72, %v1722_v59  ;;  %v1760_v30 = vadd.s32 88, %v1722_v59 }
  0xfc   : > { %v1700_v27 = vsub.f32 %v495_v23, %v577_v43  ;;  %v633_v43 = vsel %vm610_vm1, %v1698_v26, -inf  ;;  %v667_v23 = vcvt.s32.f32 %v1725_v62  ;;  %v1763_v31 = vadd.s32 96, %v1722_v59 }
  0xfd   : > { %v1248_v33 = vpop.f32.mrf.mxu0  ;;  %v634_v52 = vmax.f32 %v626_v47, %v633_v43  ;;  %v679_v34 = vcvt.s32.f32 %v1734_v15  ;;  %v1768_v35 = vadd.s32 104, %v1722_v59  ;;  %v665_v38 = vcvt.s32.f32 %v1722_v59 }
  0xfe   : > { %v631_v36 = vsel %vm610_vm1, %v1700_v27, -inf  ;;  %v1714_v37 = vsub.f32 %v1248_v33, %v592_v28  ;;  %v1754_v28 = vadd.s32 64, %v1722_v59  ;;  %v675_v33 = vcvt.s32.f32 %v1731_v8  ;;  %v818_v8 = vpop.trf.xlu0 }
  0xff   : > { %v505_v42 = vpop.f32.mrf.mxu0  ;;  %v632_v50 = vmax.f32 %v624_v41, %v631_v36  ;;  %v1771_v36 = vadd.s32 120, %v1722_v59  ;;  %v666_v39 = vcvt.s32.f32 %v1737_v16  ;;  %v668_v40 = vcvt.s32.f32 %v1740_v19 }
 0x100   : > { %v637_v45 = vsel %vm610_vm1, %v1714_v37, -inf  ;;  %v608_v46 = vsub.f32 %v505_v42, %v1658_v44  ;;  %v1728_v44 = vadd.s32 48, %v1722_v59  ;;  %v669_v42 = vcvt.s32.f32 %v1743_v20 }
 0x101   : > { %v638_v53 = vmax.f32 %v630_v48, %v637_v45  ;;  %v639_v56 = vmax.f32 %v632_v50, %v634_v52  ;;  %v670_v43 = vcvt.s32.f32 %v1746_v21  ;;  %v672_v45 = vcvt.s32.f32 %v1751_v25 }
 0x102   : > { %v635_v51 = vsel %vm610_vm1, %v608_v46, -inf  ;;  %v671_v24 = vcvt.s32.f32 %v1728_v44  ;;  %v673_v47 = vcvt.s32.f32 %v1754_v28  ;;  %v674_v48 = vcvt.s32.f32 %v1757_v29  ;;  %v819_v44 = vpop.trf.xlu0 }
 0x103   : > { %v636_v54 = vmax.f32 %v628_v49, %v635_v51  ;;  %v676_v49 = vcvt.s32.f32 %v1760_v30  ;;  %v677_v50 = vcvt.s32.f32 %v1763_v31 }
 0x105   : > { %v640_v57 = vmax.f32 %v636_v54, %v638_v53 }
 0x106   : > { %v820_v15 = vpop.trf.xlu0 }
 0x107   : > { %v641_v58 = vmax.f32 %v639_v56, %v640_v57 }
 0x109   : > { %v642_v60 = vrot.slane %v641_v58, 4 }
 0x10b   : > { %v643_v61 = vmax.f32 %v641_v58, %v642_v60 }
 0x10d   : > { %v644_v0 = vrot.slane %v643_v61, 2 }
 0x10f   : > { %v645_v22 = vmax.f32 %v643_v61, %v644_v0 }
 0x111   : > { %v646_v32 = vrot.slane %v645_v22, 1 }
 0x113   : > { %v647_v41 = vmax.f32 %v645_v22, %v646_v32 }
 0x115   : > { %vm683_vm2 = vcmp.ge.f32.partialorder %v1676_v13, %v647_v41  ;;  %vm687_vm3 = vcmp.ge.f32.partialorder %v1670_v10, %v647_v41  ;;  %vm691_vm4 = vcmp.ge.f32.partialorder %v1684_v18, %v647_v41  ;;  %vm695_vm5 = vcmp.ge.f32.partialorder %v608_v46, %v647_v41 }
 0x116   : > { %v699_v51 = vsel %vm683_vm2, %v667_v23, 128.0  ;;  %v703_v52 = vsel %vm687_vm3, %v671_v24, 128.0  ;;  %v707_v53 = vsel %vm691_vm4, %v675_v33, 128.0  ;;  %v711_v54 = vsel %vm695_vm5, %v679_v34, 128.0 }
 0x117   : > { %v715_v55 = vsel %vm610_vm1, %v699_v51, inf  ;;  %v721_v13 = vsel %vm610_vm1, %v703_v52, inf  ;;  %v678_v10 = vcvt.s32.f32 %v1768_v35  ;;  %v680_v18 = vcvt.s32.f32 %v1771_v36 }
 0x118   : > { %v722_v46 = vmin.f32 %v715_v55, %v721_v13  ;;  %v729_v56 = vsel %vm610_vm1, %v707_v53, inf  ;;  %vm681_vm6 = vcmp.ge.f32.partialorder %v1664_v2, %v647_v41  ;;  %vm682_vm7 = vcmp.ge.f32.partialorder %v1662_v1, %v647_v41 }
 0x119   : > { %v737_v57 = vsel %vm610_vm1, %v711_v54, inf  ;;  %vm684_vm8 = vcmp.ge.f32.partialorder %v1674_v12, %v647_v41  ;;  %vm685_vm9 = vcmp.ge.f32.partialorder %v1660_v63, %v647_v41  ;;  %vm686_vm10 = vcmp.ge.f32.partialorder %v1666_v3, %v647_v41 }
 0x11a   : > { %v730_v58 = vmin.f32 %v722_v46, %v729_v56  ;;  %vm688_vm11 = vcmp.ge.f32.partialorder %v1668_v6, %v647_v41  ;;  %vm689_vm12 = vcmp.ge.f32.partialorder %v1672_v11, %v647_v41  ;;  %vm693_vm13 = vcmp.ge.f32.partialorder %v1700_v27, %v647_v41 }
 0x11b   : > { %vm690_vm14 = vcmp.ge.f32.partialorder %v1678_v14, %v647_v41  ;;  %vm692_vm15 = vcmp.ge.f32.partialorder %v1682_v17, %v647_v41  ;;  %v697_v1 = vsel %vm681_vm6, %v665_v38, 128.0  ;;  %v698_v2 = vsel %vm682_vm7, %v666_v39, 128.0 }
 0x11c   : > { %v738_v63 = vmin.f32 %v730_v58, %v737_v57  ;;  %v700_v3 = vsel %vm684_vm8, %v668_v40, 128.0  ;;  %v701_v6 = vsel %vm685_vm9, %v669_v42, 128.0  ;;  %v702_v11 = vsel %vm686_vm10, %v670_v43, 128.0 }
 0x11d   : > { %vm694_vm0 = vcmp.ge.f32.partialorder %v1698_v26, %v647_v41  ;;  %vm696_vm2 = vcmp.ge.f32.partialorder %v1714_v37, %v647_v41  ;;  %v704_v12 = vsel %vm688_vm11, %v672_v45, 128.0  ;;  %v705_v14 = vsel %vm689_vm12, %v673_v47, 128.0 }
 0x11e   : > { %v706_v17 = vsel %vm690_vm14, %v674_v48, 128.0  ;;  %v708_v27 = vsel %vm692_vm15, %v676_v49, 128.0  ;;  %v709_v60 = vsel %vm693_vm13, %v677_v50, 128.0  ;;  %v713_v61 = vsel %vm610_vm1, %v697_v1, inf }
 0x11f   : > { %v714_v26 = vsel %vm610_vm1, %v698_v2, inf  ;;  %v716_v37 = vsel %vm610_vm1, %v700_v3, inf  ;;  %v717_v0 = vsel %vm610_vm1, %v701_v6, inf  ;;  %v719_v22 = vsel %vm610_vm1, %v702_v11, inf }
 0x120   : > { %v710_v32 = vsel %vm694_vm0, %v678_v10, 128.0  ;;  %v718_v36 = vmin.f32 %v713_v61, %v717_v0  ;;  %v720_v41 = vmin.f32 %v714_v26, %v719_v22  ;;  %v723_v51 = vsel %vm610_vm1, %v704_v12, inf }
 0x121   : > { %v712_v52 = vsel %vm696_vm2, %v680_v18, 128.0  ;;  %v724_v53 = vmin.f32 %v716_v37, %v723_v51  ;;  %v725_v54 = vsel %vm610_vm1, %v705_v14, inf  ;;  %v727_v55 = vsel %vm610_vm1, %v706_v17, inf }
 0x122   : > { %v726_v13 = vmin.f32 %v718_v36, %v725_v54  ;;  %v728_v46 = vmin.f32 %v720_v41, %v727_v55  ;;  %v731_v56 = vsel %vm610_vm1, %v708_v27, inf  ;;  %v733_v58 = vsel %vm610_vm1, %v709_v60, inf }
 0x123   : > { %v732_v57 = vmin.f32 %v724_v53, %v731_v56  ;;  %v735_v1 = vsel %vm610_vm1, %v710_v32, inf  ;;  %v739_v6 = vsel %vm610_vm1, %v712_v52, inf  ;;  %v1429_v36 = vmov 1.0  }
 0x124   : > { %v734_v2 = vmin.f32 %v726_v13, %v733_v58  ;;  %v736_v3 = vmin.f32 %v728_v46, %v735_v1  ;;  %vm751_vm6 = vcmask 122880  }
 0x125   : > { %v740_v11 = vmin.f32 %v732_v57, %v739_v6 }
 0x126   : > { %v741_v12 = vmin.f32 %v734_v2, %v736_v3 }
 0x127   : > { %v742_v61 = vmin.f32 %v738_v63, %v740_v11 }
 0x129   : > { %v743_v14 = vmin.f32 %v741_v12, %v742_v61 }
 0x12b   : > { %v744_v26 = vrot.slane %v743_v14, 4 }
 0x12d   : > { %v745_v17 = vmin.f32 %v743_v14, %v744_v26 }
 0x12f   : > { %v746_v37 = vrot.slane %v745_v17, 2 }
 0x131   : > { %v747_v0 = vmin.f32 %v745_v17, %v746_v37 }
 0x133   : > { %v748_v22 = vrot.slane %v747_v0, 1 }
 0x135   : > { %v749_v27 = vmin.f32 %v747_v0, %v748_v22 }
 0x137   : > { %vm768_vm3 = vcmp.eq.f32.partialorder %v680_v18, %v749_v27  ;;  %vm767_vm4 = vcmp.eq.f32.partialorder %v679_v34, %v749_v27  ;;  %vm766_vm5 = vcmp.eq.f32.partialorder %v678_v10, %v749_v27  ;;  %v1287_v63 = vtrunc.f32 %v749_v27 }
 0x138   : > { %1249 = vmatprep.subr.msk.mxu1 %vm768_vm3, %v1429_v36  ;;  %vm765_vm7 = vcmp.eq.f32.partialorder %v677_v50, %v749_v27  ;;  %vm764_vm8 = vcmp.eq.f32.partialorder %v676_v49, %v749_v27  ;;  %vm763_vm9 = vcmp.eq.f32.partialorder %v675_v33, %v749_v27  ;;  %vm762_vm10 = vcmp.eq.f32.partialorder %v674_v48, %v749_v27 }
 0x139   : > { %1250 = vmatpush3.msk.msra.mxu1 %vm768_vm3, %v1429_v36  ;;  %v1288_v18 = vcvt.f32.s32 %v1287_v63  ;;  %vm761_vm11 = vcmp.eq.f32.partialorder %v673_v47, %v749_v27  ;;  %vm760_vm12 = vcmp.eq.f32.partialorder %v672_v45, %v749_v27  ;;  %vm759_vm13 = vcmp.eq.f32.partialorder %v671_v24, %v749_v27 }
 0x13a   : > { %1251 = vmatprep.subr.msk.mxu1 %vm767_vm4, %v1429_v36  ;;  %vm758_vm14 = vcmp.eq.f32.partialorder %v670_v43, %v749_v27  ;;  %vm757_vm15 = vcmp.eq.f32.partialorder %v669_v42, %v749_v27  ;;  %vm756_vm0 = vcmp.eq.f32.partialorder %v668_v40, %v749_v27  ;;  %vm755_vm2 = vcmp.eq.f32.partialorder %v667_v23, %v749_v27 }
 0x13b   : > { %1252 = vmatpush3.msk.msra.mxu1 %vm767_vm4, %v1429_v36  ;;  %752 = vst.msk [vmem:[%s1857_s12] sm:$0x1] %vm751_vm6, %v1288_v18  ;;  %vm754_vm3 = vcmp.eq.f32.partialorder %v666_v39, %v749_v27  ;;  %vm753_vm4 = vcmp.eq.f32.partialorder %v665_v38, %v749_v27 }
 0x13c   : > { %1253 = vmatprep.subr.msk.mxu1 %vm766_vm5, %v1429_v36 }
 0x13d   : > { %1254 = vmatpush3.msk.msra.mxu1 %vm766_vm5, %v1429_v36 }
 0x13e   : > { %1255 = vmatprep.subr.msk.mxu1 %vm765_vm7, %v1429_v36 }
 0x13f   : > { %1256 = vmatpush3.msk.msra.mxu1 %vm765_vm7, %v1429_v36 }
 0x140   : > { %1257 = vmatprep.subr.msk.mxu1 %vm764_vm8, %v1429_v36 }
 0x141   : > { %1258 = vmatpush3.msk.msra.mxu1 %vm764_vm8, %v1429_v36 }
 0x142   : > { %1259 = vmatprep.subr.msk.mxu1 %vm763_vm9, %v1429_v36 }
 0x143   : > { %1260 = vmatpush3.msk.msra.mxu1 %vm763_vm9, %v1429_v36 }
 0x144   : > { %1261 = vmatprep.subr.msk.mxu1 %vm762_vm10, %v1429_v36 }
 0x145   : > { %1262 = vmatpush3.msk.msra.mxu1 %vm762_vm10, %v1429_v36 }
 0x146   : > { %1263 = vmatprep.subr.msk.mxu1 %vm761_vm11, %v1429_v36 }
 0x147   : > { %1264 = vmatpush3.msk.msra.mxu1 %vm761_vm11, %v1429_v36 }
 0x148   : > { %1265 = vmatprep.subr.msk.mxu1 %vm760_vm12, %v1429_v36 }
 0x149   : > { %1266 = vmatpush3.msk.msra.mxu1 %vm760_vm12, %v1429_v36 }
 0x14a   : > { %1267 = vmatprep.subr.msk.mxu1 %vm759_vm13, %v1429_v36 }
 0x14b   : > { %1268 = vmatpush3.msk.msra.mxu1 %vm759_vm13, %v1429_v36 }
 0x14c   : > { %1269 = vmatprep.subr.msk.mxu1 %vm758_vm14, %v1429_v36 }
 0x14d   : > { %1270 = vmatpush3.msk.msra.mxu1 %vm758_vm14, %v1429_v36 }
 0x14e   : > { %1271 = vmatprep.subr.msk.mxu1 %vm757_vm15, %v1429_v36 }
 0x14f   : > { %1272 = vmatpush3.msk.msra.mxu1 %vm757_vm15, %v1429_v36 }
 0x150   : > { %1273 = vmatprep.subr.msk.mxu1 %vm756_vm0, %v1429_v36 }
 0x151   : > { %1274 = vmatpush3.msk.msra.mxu1 %vm756_vm0, %v1429_v36 }
 0x152   : > { %1275 = vmatprep.subr.msk.mxu1 %vm755_vm2, %v1429_v36 }
 0x153   : > { %1276 = vmatpush3.msk.msra.mxu1 %vm755_vm2, %v1429_v36 }
 0x154   : > { %1277 = vmatprep.subr.msk.mxu1 %vm754_vm3, %v1429_v36 }
 0x155   : > { %1278 = vmatpush3.msk.msra.mxu1 %vm754_vm3, %v1429_v36 }
 0x156   : > { %1279 = vmatprep.subr.msk.mxu1 %vm753_vm4, %v1429_v36 }
 0x157   : > { %1280 = vmatpush3.msk.msra.mxu1 %vm753_vm4, %v1429_v36 }
 0x158   : > { %1282 = vmatmul.mubr.f32.vlgmr.msra.gmra.mxu1 %v818_v8 }
 0x159   : > { %1284 = vmatprep.mubr.f32.mxu1 %v819_v44 }
 0x15c   : > { %1285 = vmatmul.mubr.f32.gmra.mxu1 %v820_v15 }
 0x218   : > { %v1283_v62 = vpop.f32.mrf.mxu1 }
 0x219   : > { %919 = vst.msk [vmem:[%s277_s13 + $0x8] sm:$0xff] %vm610_vm1, %v1283_v62  ;;  %v923_v16 = vsub.f32 %v1283_v62, %v1548_v7 }
 0x21a   : > { %v899_v19 = vpop.f32.mrf.mxu1 }
 0x21b   : > { %918 = vst.msk [vmem:[%s277_s13] sm:$0xff] %vm610_vm1, %v899_v19  ;;  %v922_v59 = vsub.f32 %v899_v19, %v1555_v9  ;;  %v927_v21 = vmul.f32 %v923_v16, %v923_v16 }
 0x21c   : > { %v1286_v20 = vpop.f32.mrf.mxu1 }
 0x21d   : > { %v926_v23 = vmul.f32 %v922_v59, %v922_v59  ;;  %921 = vst.msk [vmem:[%s277_s13 + $0x18] sm:$0xff] %vm610_vm1, %v1286_v20  ;;  %v925_v24 = vsub.f32 %v1286_v20, %v1539_v4  ;;  %v931_v29 = vsel %vm610_vm1, %v927_v21, 0.0 }
 0x21e   : > { %v909_v25 = vpop.f32.mrf.mxu1 }
 0x21f   : > { %v930_v28 = vsel %vm610_vm1, %v926_v23, 0.0  ;;  %920 = vst.msk [vmem:[%s277_s13 + $0x10] sm:$0xff] %vm610_vm1, %v909_v25  ;;  %v924_v7 = vsub.f32 %v909_v25, %v1541_v5  ;;  %v929_v9 = vmul.f32 %v925_v24, %v925_v24 }
 0x220   : > { %v932_v31 = vadd.f32 %v931_v29, %v930_v28 }
 0x221   : > { %v928_v30 = vmul.f32 %v924_v7, %v924_v7  ;;  %v935_v4 = vsel %vm610_vm1, %v929_v9, 0.0 }
 0x223   : > { %v933_v33 = vsel %vm610_vm1, %v928_v30, 0.0 }
 0x224   : > { %v934_v34 = vadd.f32 %v933_v33, %v932_v31 }
 0x226   : > { %v936_v35 = vadd.f32 %v935_v4, %v934_v34 }
 0x228   : > { %937 = vadd.xlane.f32.xlu1 %v936_v35 }
 0x229   : > { %1363 = shalt.err (!%p1360_p5)
}
 0x22a   : > { %s1364_s21 = scalar_lea.hbm %s978_s24, 16  ;;  %s1368_s15 = scalar_lea.hbm %s1948_s4, 32 }
 0x22b   : > { %p1365_p6 = scmp.ne.s32.totalorder %s978_s24, %s1364_s21  ;;  %p1369_p10 = scmp.lt.s32.totalorder %s978_s24, %s1948_s4 }
 0x22c   : > { %p1370_p11 = scmp.lt.s32.totalorder %s1368_s15, %s1364_s21 }
 0x22d   : > { %p1366_p7 = pnand %p1365_p6, %p1501_p4 }
 0x22e   : > { %p1371_p12 = por %p1370_p11, %p1369_p10 }
 0x22f   : > { %p1367_p9 = pneg %p1366_p7 }
 0x231   : > { %p1372_p13 = pnand %p1371_p12, %p1367_p9 }
 0x233   : > { %1375 = shalt.err (!%p1372_p13)
}
 0x234   : > { %1291 = dma.vmem_to_hbm [thread:$0]  (%p1501_p4), %s981_s25, 16, %s978_s24, %s958_s27   ;;  %vm947_vm1 = vcmask 0  }
 0x235   : > { %s283_s29 = scalar_lea.vmem %s1949_s5, %s1525_s9 }
 0x2b1   : > { %v938_v5 = vpop.xlane.xlu1 %937 }
 0x2b2   : > { %v939_v38 = vrot.slane %v938_v5, 4 }
 0x2b4   : > { %v940_v39 = vadd.f32 %v939_v38, %v938_v5 }
 0x2b6   : > { %v941_v40 = vrot.slane %v940_v39, 2 }
 0x2b8   : > { %v942_v42 = vadd.f32 %v941_v40, %v940_v39 }
 0x2ba   : > { %v943_v43 = vrot.slane %v942_v42, 1 }
 0x2bc   : > { %v944_v45 = vadd.f32 %v943_v43, %v942_v42 }
 0x2be   : > { %1289 = vpush %v944_v45 }
 0x2ef   : > { %s1290_s7 = spop %1289 }
 0x2f0   : > { %v946_v47 = vstv %s1290_s7 }
 0x2f1   : > { %948 = vst.msk [vmem:[%s283_s29] sm:$0x1] %vm947_vm1, %v946_v47 }
 0x2f2 PF: > { %p1297_p4 = scmp.ge.s32.totalorder %s1426_s23, 2  ;;  %s1006_s28 = sand.u32 1, %s1406_s18  }
 0x2f3   : > { %s1007_s24 = scalar_lea.sflag [#allocation3], %s1006_s28 }
 0x2f4   : > { %p1294_p0 = pnand %p1297_p4, %p1508_p8 }
 0x2f6   : > { %p1295_p1 = pneg %p1294_p0 }
 0x2f8   : > { %1401 = dma.done.wait (%p1295_p1), %s1007_s24, 16  }
 0x2f9   : > { %1403 = vsyncadd (%p1295_p1), %s1007_s24, 4294967280  ;;  %s19_s23 = sadd.s32 1, %s1426_s23   ;;  %s1952_s18 = smov %s1410_s19 }
 0x2fa   : > { %p16_p2 = scmp.ge.s32.totalorder %s19_s23, 4   ;;  %s1953_s19 = smov %s1414_s20 }
 0x2fb   : > { %s1954_s20 = smov %s1514_s6  ;;  %s1955_s21 = smov %s1422_s22 }
 0x2fc   : > { %s1956_s22 = smov %s1958_s26  ;;  %18 = sbr.rel (!%p16_p2) target bundleno = 4 (0x4), region = 91 }
 0x301   :  { %1020 = vsyncpa [#allocation3], 1 }
 0x302   :  { %1022 = vsyncpa [#allocation3 + $0x1], 1 }

// kernel: tpu_custom_call.1
= control target key start
LH: loop header
LB: loop body
LE: loop exit
PB: predicated region body
PF: predicated region fallthrough
CT: control target
= control target key end

     0   :  { %11 = vsyncpa [#allocation3], 0  ;;  %s1944_s0 = inlined_call_operand.vmem [shape: f32[2,32,16], index: 0, kind: input, shape index: {}]   ;;  %s1945_s1 = inlined_call_operand.vmem [shape: f32[128,32], index: 1, kind: input, shape index: {}]   ;;  %s1946_s2 = inlined_call_operand.vmem [shape: f32[128,1], index: 2, kind: input, shape index: {}]   ;;  %s1947_s3 = inlined_call_operand.vmem [shape: f32[2,32,16], index: 3, kind: output, shape index: {0}]   ;;  %s1948_s4 = inlined_call_operand.hbm [shape: s32[2,1,16], index: 4, kind: output, shape index: {1}]   ;;  %s1949_s5 = inlined_call_operand.vmem [shape: f32[2,1,1,1], index: 5, kind: output, shape index: {2}]  }
   0x1   :  { %13 = vsyncpa [#allocation3 + $0x1], 0  ;;  %s1461_s18 = smov 0   ;;  %s1463_s19 = smov 0  }
   0x2   :  { %s1465_s20 = smov 0   ;;  %s1467_s21 = smov 0  }
   0x3   :  { %s1469_s22 = smov 0   ;;  %s1471_s23 = smov 0  }
   0x4 LB: > { %s1115_s24 = sadd.s32 4294967295, %s1426_s23   ;;  %s1116_s25 = sadd.s32 4294967294, %s1426_s23   ;;  %s1426_s23 = sphi %s1471_s23, %s19_s23   ;;  %s1422_s22 = sphi %s1469_s22, %s1956_s22   ;;  %s1418_s21 = sphi %s1467_s21, %s1955_s21   ;;  %s1414_s20 = sphi %s1465_s20, %s1954_s20   ;;  %s1410_s19 = sphi %s1463_s19, %s1953_s19   ;;  %s1406_s18 = sphi %s1461_s18, %s1952_s18  }
   0x5   : > { %s31_s26 = sadd.s32 1, %s1422_s22  ;;  %s138_s27 = sadd.s32 1, %s1414_s20 }
   0x6   : > { %p33_p0 = scmp.ge.s32.totalorder %s31_s26, 2  ;;  %p148_p1 = scmp.ne.s32.totalorder %s1414_s20, %s1410_s19 }
   0x7   : > { %p149_p2 = scmp.eq.s32.totalorder %s1115_s24, 1  ;;  %p154_p3 = scmp.ne.s32.totalorder %s1410_s19, %s1406_s18 }
   0x8   : > { %s1958_s26 = smov (%p33_p0, %s31_s26), 0  ;;  %p155_p5 = scmp.eq.s32.totalorder %s1116_s25, 1 }
   0x9   : > { %p1501_p4 = por %p149_p2, %p148_p1  ;;  %s133_s29 = ssub.s32 %s1422_s22, %s1958_s26 }
   0xa   : > { %p1119_p6 = scmp.ge.s32.totalorder %s1426_s23, 1  ;;  %p136_p7 = scmp.eq.s32.totalorder %s133_s29, 0 }
   0xb   : > { %p1508_p8 = por %p155_p5, %p154_p3  ;;  %p218_p9 = scmp.lt.s32.totalorder %s1426_s23, 3 }
   0xc   : > { %s1514_s6 = scalar_select %p136_p7, %s1414_s20, %s138_s27  }
   0xd   : > { %p219_p10 = pnand %p1119_p6, %p218_p9 }
   0xe   : > { %p262_p11 = scmp.lt.s32.totalorder (!%p219_p10), %s1418_s21, 1  ;;  %s252_s11 = sand.u32 (!%p219_p10), 1, %s1410_s19  }
   0xf   : > { %222 = sbr.rel (%p219_p10) target bundleno = 754 (0x2f2), region = 32  ;;  %s1857_s12 = scalar_lea.vmem (!%p219_p10), [#allocation2], %s252_s11 }
  0x10   : > { %s980_s25 = sshll.u32 (!%p219_p10), %s1857_s12, 4  ;;  %s958_s27 = scalar_lea.sflag (!%p219_p10), [#allocation3], %s252_s11  ;;  %s981_s25 = int_to_ptr.vmem [resolvable:$true] %s980_s25 }
  0x11   : > { %s1350_s29 = scalar_lea.vmem (!%p219_p10), %s981_s25, 16  ;;  %s1430_s7 = smov (!%p219_p10), [#allocation2]  }
  0x12   : > { %p1351_p12 = scmp.ne.s32.totalorder (!%p219_p10), %s981_s25, %s1350_s29  ;;  %s1354_s8 = sshll.u32 (!%p219_p10), %s1430_s7, 4  ;;  %s1355_s8 = int_to_ptr.vmem [resolvable:$false] %s1354_s8 }
  0x13   : > { %s1356_s14 = scalar_lea.vmem (!%p219_p10), %s1355_s8, 32  ;;  %p1357_p1 = scmp.lt.s32.totalorder (!%p219_p10), %s981_s25, %s1355_s8 }
  0x14   : > { %v1520_v0 = vld [vmem:[%s1945_s1] sm:$0xff]  ;;  %vm320_vm0 = vcmask 261120   ;;  %v1428_v1 = vmov 0   ;;  %s1525_s9 = scalar_select %p262_p11, %s1418_s21, 1  ;;  %v306_v2 = vld [vmem:[%s1946_s2 + $0x10] sm:$0xff]  ;;  %v307_v6 = vld [vmem:[%s1946_s2 + $0x18] sm:$0xff] }
  0x15   : > { %1225 = vmatprep.mubr.msk.f32.mxu0 %vm320_vm0, %v1520_v0  ;;  %1349 = vset.pattern.permute.xlu1 %v1428_v1  ;;  %v304_v3 = vld [vmem:[%s1946_s2] sm:$0xff]  ;;  %v305_v8 = vld [vmem:[%s1946_s2 + $0x8] sm:$0xff]  ;;  %v290_v13 = vld [vmem:[%s1945_s1 + $0x10] sm:$0xff]  ;;  %vm610_vm1 = vcmask 130048   ;;  %p1352_p13 = pnand %p1351_p12, %p1501_p4  ;;  %p1358_p2 = scmp.lt.s32.totalorder %s1356_s14, %s1350_s29 }
  0x16   : > { %1348 = vset.pattern.permute.xlu0 %v1428_v1  ;;  %s1175_s10 = sshll.u32 %s1525_s9, 5  ;;  %526 = vperm.xlu1 %1349, %v306_v2   ;;  %v309_v10 = vld [vmem:[%s1946_s2 + $0x28] sm:$0xff]  ;;  %v308_v12 = vld [vmem:[%s1946_s2 + $0x20] sm:$0xff]  ;;  %v311_v14 = vld [vmem:[%s1946_s2 + $0x38] sm:$0xff] }
  0x17   : > { %s269_s13 = scalar_lea.vmem %s1944_s0, %s1175_s10  ;;  %516 = vperm.xlu0 %1348, %v304_v3   ;;  %v289_v11 = vld [vmem:[%s1945_s1 + $0x8] sm:$0xff]  ;;  %v291_v15 = vld [vmem:[%s1945_s1 + $0x18] sm:$0xff]  ;;  %v310_v16 = vld [vmem:[%s1946_s2 + $0x30] sm:$0xff]  ;;  %p1353_p0 = pneg %p1352_p13 }
  0x18   : > { %v1539_v4 = vld [vmem:[%s269_s13 + $0x18] sm:$0xff]  ;;  %v1541_v5 = vld [vmem:[%s269_s13 + $0x10] sm:$0xff]  ;;  %v1548_v7 = vld [vmem:[%s269_s13 + $0x8] sm:$0xff]  ;;  %p1359_p3 = por %p1358_p2, %p1357_p1 }
  0x19   : > { %1217 = vmatprep.subr.mxu0 %v1539_v4  ;;  %v1555_v9 = vld [vmem:[%s269_s13] sm:$0xff]  ;;  %v313_v18 = vld [vmem:[%s1946_s2 + $0x48] sm:$0xff]  ;;  %v294_v21 = vld [vmem:[%s1945_s1 + $0x30] sm:$0xff]  ;;  %s277_s13 = scalar_lea.vmem %s1947_s3, %s1175_s10  ;;  %s1172_s10 = sshll.u32 %s1418_s21, 4 }
  0x1a   : > { %1218 = vmatpush3.msra.mxu0 %v1539_v4  ;;  %531 = vperm.xlu1 %1349, %v307_v6   ;;  %v292_v17 = vld [vmem:[%s1945_s1 + $0x20] sm:$0xff]  ;;  %v293_v19 = vld [vmem:[%s1945_s1 + $0x28] sm:$0xff]  ;;  %v315_v22 = vld [vmem:[%s1946_s2 + $0x58] sm:$0xff]  ;;  %s978_s24 = scalar_lea.hbm %s1948_s4, %s1172_s10  ;;  %p1360_p5 = pnand %p1359_p3, %p1353_p0 }
  0x1b   : > { %1219 = vmatprep.subr.mxu0 %v1541_v5  ;;  %521 = vperm.xlu0 %1348, %v305_v8   ;;  %v312_v20 = vld [vmem:[%s1946_s2 + $0x40] sm:$0xff]  ;;  %v295_v23 = vld [vmem:[%s1945_s1 + $0x38] sm:$0xff]  ;;  %v314_v24 = vld [vmem:[%s1946_s2 + $0x50] sm:$0xff] }
  0x1c   : > { %1220 = vmatpush3.msra.mxu0 %v1541_v5  ;;  %v296_v25 = vld [vmem:[%s1945_s1 + $0x40] sm:$0xff]  ;;  %v317_v26 = vld [vmem:[%s1946_s2 + $0x68] sm:$0xff]  ;;  %v298_v29 = vld [vmem:[%s1945_s1 + $0x50] sm:$0xff] }
  0x1d   : > { %1221 = vmatprep.subr.mxu0 %v1548_v7  ;;  %v297_v27 = vld [vmem:[%s1945_s1 + $0x48] sm:$0xff]  ;;  %v316_v28 = vld [vmem:[%s1946_s2 + $0x60] sm:$0xff]  ;;  %v319_v30 = vld [vmem:[%s1946_s2 + $0x78] sm:$0xff] }
  0x1e   : > { %1222 = vmatpush3.msra.mxu0 %v1548_v7  ;;  %541 = vperm.xlu1 %1349, %v309_v10   ;;  %v299_v31 = vld [vmem:[%s1945_s1 + $0x58] sm:$0xff]  ;;  %v318_v32 = vld [vmem:[%s1946_s2 + $0x70] sm:$0xff]  ;;  %v300_v33 = vld [vmem:[%s1945_s1 + $0x60] sm:$0xff] }
  0x1f   : > { %1223 = vmatprep.subr.mxu0 %v1555_v9  ;;  %536 = vperm.xlu0 %1348, %v308_v12   ;;  %v301_v34 = vld [vmem:[%s1945_s1 + $0x68] sm:$0xff]  ;;  %v302_v35 = vld [vmem:[%s1945_s1 + $0x70] sm:$0xff]  ;;  %v303_v36 = vld [vmem:[%s1945_s1 + $0x78] sm:$0xff] }
  0x20   : > { %1224 = vmatpush3.msra.mxu0 %v1555_v9 }
  0x21   : > { %1226 = vmatmul.mubr.msk.f32.vlgmr.msra.gmra.mxu0 %vm320_vm0, %v289_v11 }
  0x22   : > { %1228 = vmatprep.mubr.msk.f32.mxu0 %vm320_vm0, %v290_v13  ;;  %551 = vperm.xlu1 %1349, %v311_v14  }
  0x23   : > { %546 = vperm.xlu0 %1348, %v310_v16  }
  0x25   : > { %1229 = vmatmul.mubr.msk.f32.gmra.mxu0 %vm320_vm0, %v291_v15 }
  0x26   : > { %1231 = vmatprep.mubr.msk.f32.mxu0 %vm320_vm0, %v292_v17  ;;  %561 = vperm.xlu1 %1349, %v313_v18  }
  0x27   : > { %556 = vperm.xlu0 %1348, %v312_v20  }
  0x29   : > { %1232 = vmatmul.mubr.msk.f32.gmra.mxu0 %vm320_vm0, %v293_v19 }
  0x2a   : > { %1234 = vmatprep.mubr.msk.f32.mxu0 %vm320_vm0, %v294_v21  ;;  %571 = vperm.xlu1 %1349, %v315_v22  }
  0x2b   : > { %566 = vperm.xlu0 %1348, %v314_v24  }
  0x2d   : > { %1235 = vmatmul.mubr.msk.f32.gmra.mxu0 %vm320_vm0, %v295_v23 }
  0x2e   : > { %1237 = vmatprep.mubr.msk.f32.mxu0 %vm320_vm0, %v296_v25  ;;  %581 = vperm.xlu1 %1349, %v317_v26  }
  0x2f   : > { %576 = vperm.xlu0 %1348, %v316_v28  }
  0x31   : > { %1238 = vmatmul.mubr.msk.f32.gmra.mxu0 %vm320_vm0, %v297_v27 }
  0x32   : > { %1240 = vmatprep.mubr.msk.f32.mxu0 %vm320_vm0, %v298_v29  ;;  %591 = vperm.xlu1 %1349, %v319_v30  }
  0x33   : > { %586 = vperm.xlu0 %1348, %v318_v32  }
  0x35   : > { %1241 = vmatmul.mubr.msk.f32.gmra.mxu0 %vm320_vm0, %v299_v31 }
  0x36   : > { %1243 = vmatprep.mubr.msk.f32.mxu0 %vm320_vm0, %v300_v33 }
  0x39   : > { %1244 = vmatmul.mubr.msk.f32.gmra.mxu0 %vm320_vm0, %v301_v34 }
  0x3a   : > { %1246 = vmatprep.mubr.msk.f32.mxu0 %vm320_vm0, %v302_v35 }
  0x3d   : > { %1247 = vmatmul.mubr.msk.f32.gmra.mxu0 %vm320_vm0, %v303_v36 }
  0x51   : > { %801 = vxpose.xlu0.b32.start [1/16] (narrow) %v1520_v0, 32 }
  0x55   : > { %802 = vxpose.xlu0.b32.cont [2/16] (narrow) %v289_v11, 32 }
  0x59   : > { %803 = vxpose.xlu0.b32.cont [3/16] (narrow) %v290_v13, 32 }
  0x5d   : > { %804 = vxpose.xlu0.b32.cont [4/16] (narrow) %v291_v15, 32 }
  0x61   : > { %805 = vxpose.xlu0.b32.cont [5/16] (narrow) %v292_v17, 32 }
  0x65   : > { %806 = vxpose.xlu0.b32.cont [6/16] (narrow) %v293_v19, 32 }
  0x69   : > { %807 = vxpose.xlu0.b32.cont [7/16] (narrow) %v294_v21, 32 }
  0x6d   : > { %808 = vxpose.xlu0.b32.cont [8/16] (narrow) %v295_v23, 32 }
  0x71   : > { %809 = vxpose.xlu0.b32.cont [9/16] (narrow) %v296_v25, 32 }
  0x75   : > { %810 = vxpose.xlu0.b32.cont [10/16] (narrow) %v297_v27, 32 }
  0x79   : > { %811 = vxpose.xlu0.b32.cont [11/16] (narrow) %v298_v29, 32 }
  0x7d   : > { %812 = vxpose.xlu0.b32.cont [12/16] (narrow) %v299_v31, 32 }
  0x81   : > { %813 = vxpose.xlu0.b32.cont [13/16] (narrow) %v300_v33, 32 }
  0x85   : > { %814 = vxpose.xlu0.b32.cont [14/16] (narrow) %v301_v34, 32 }
  0x89   : > { %815 = vxpose.xlu0.b32.cont [15/16] (narrow) %v302_v35, 32 }
  0x8d   : > { %816 = vxpose.xlu0.b32.end [16/16] (narrow) %v303_v36, 32 }
  0x91   : > { %v527_v46 = vpop.permute.xlu1 %526 }
  0x92   : > { %v517_v37 = vpop.permute.xlu0 %516 }
  0x95   : > { %v532_v47 = vpop.permute.xlu1 %531 }
  0x96   : > { %v522_v38 = vpop.permute.xlu0 %521 }
  0x99   : > { %v542_v48 = vpop.permute.xlu1 %541 }
  0x9a   : > { %v537_v39 = vpop.permute.xlu0 %536 }
  0x9d   : > { %v552_v51 = vpop.permute.xlu1 %551 }
  0x9e   : > { %v547_v40 = vpop.permute.xlu0 %546 }
  0xa1   : > { %v562_v55 = vpop.permute.xlu1 %561 }
  0xa2   : > { %v557_v41 = vpop.permute.xlu0 %556 }
  0xa5   : > { %v572_v59 = vpop.permute.xlu1 %571 }
  0xa6   : > { %v567_v42 = vpop.permute.xlu0 %566 }
  0xa9   : > { %v582_v0 = vpop.permute.xlu1 %581 }
  0xaa   : > { %v577_v43 = vpop.permute.xlu0 %576 }
  0xad   : > { %v592_v28 = vpop.permute.xlu1 %591 }
  0xae   : > { %v1658_v44 = vpop.permute.xlu0 %586 }
  0xcd   : > { %v817_v45 = vpop.trf.xlu0 }
  0xce   : > { %1281 = vmatprep.mubr.f32.mxu1 %v817_v45 }
  0xe1   : > { %v1227_v49 = vpop.f32.mrf.mxu0 }
  0xe2   : > { %v1662_v1 = vsub.f32 %v1227_v49, %v522_v38 }
  0xe3   : > { %v435_v50 = vpop.f32.mrf.mxu0 }
  0xe4   : > { %v1664_v2 = vsub.f32 %v435_v50, %v517_v37  ;;  %v612_v19 = vsel %vm610_vm1, %v1662_v1, -inf }
  0xe5   : > { %v1230_v52 = vpop.f32.mrf.mxu0 }
  0xe6   : > { %v1674_v12 = vsub.f32 %v1230_v52, %v532_v47  ;;  %v611_v20 = vsel %vm610_vm1, %v1664_v2, -inf }
  0xe7   : > { %v445_v53 = vpop.f32.mrf.mxu0 }
  0xe8   : > { %v1676_v13 = vsub.f32 %v445_v53, %v527_v46  ;;  %v614_v29 = vsel %vm610_vm1, %v1674_v12, -inf }
  0xe9   : > { %v1233_v54 = vpop.f32.mrf.mxu0 }
  0xea   : > { %v1666_v3 = vsub.f32 %v1233_v54, %v542_v48  ;;  %v613_v30 = vsel %vm610_vm1, %v1676_v13, -inf }
  0xeb   : > { %v455_v56 = vpop.f32.mrf.mxu0 }
  0xec   : > { %v1660_v63 = vsub.f32 %v455_v56, %v537_v39  ;;  %v617_v21 = vsel %vm610_vm1, %v1666_v3, -inf }
  0xed   : > { %v1236_v57 = vpop.f32.mrf.mxu0  ;;  %v618_v38 = vmax.f32 %v612_v19, %v617_v21 }
  0xee   : > { %v1668_v6 = vsub.f32 %v1236_v57, %v552_v51  ;;  %v615_v16 = vsel %vm610_vm1, %v1660_v63, -inf }
  0xef   : > { %v465_v58 = vpop.f32.mrf.mxu0  ;;  %v616_v31 = vmax.f32 %v611_v20, %v615_v16 }
  0xf0   : > { %v1670_v10 = vsub.f32 %v465_v58, %v547_v40  ;;  %v621_v22 = vsel %vm610_vm1, %v1668_v6, -inf }
  0xf1   : > { %v1239_v60 = vpop.f32.mrf.mxu0  ;;  %v622_v39 = vmax.f32 %v614_v29, %v621_v22 }
  0xf2   : > { %v1678_v14 = vsub.f32 %v1239_v60, %v562_v55  ;;  %v619_v24 = vsel %vm610_vm1, %v1670_v10, -inf  ;;  %v648_v55 = vlaneseq }
  0xf3   : > { %v475_v61 = vpop.f32.mrf.mxu0  ;;  %v620_v40 = vmax.f32 %v613_v30, %v619_v24 }
  0xf4   : > { %v1672_v11 = vsub.f32 %v475_v61, %v557_v41  ;;  %v625_v32 = vsel %vm610_vm1, %v1678_v14, -inf }
  0xf5   : > { %v1242_v62 = vpop.f32.mrf.mxu0  ;;  %v626_v47 = vmax.f32 %v618_v38, %v625_v32 }
  0xf6   : > { %v1682_v17 = vsub.f32 %v1242_v62, %v572_v59  ;;  %v623_v25 = vsel %vm610_vm1, %v1672_v11, -inf  ;;  %v1722_v59 = vshrl.u32 %v648_v55, 7 }
  0xf7   : > { %v485_v8 = vpop.f32.mrf.mxu0  ;;  %v624_v41 = vmax.f32 %v616_v31, %v623_v25 }
  0xf8   : > { %v1684_v18 = vsub.f32 %v485_v8, %v567_v42  ;;  %v629_v34 = vsel %vm610_vm1, %v1682_v17, -inf  ;;  %v1725_v62 = vadd.s32 16, %v1722_v59  ;;  %v1731_v8 = vadd.s32 80, %v1722_v59 }
  0xf9   : > { %v1245_v15 = vpop.f32.mrf.mxu0  ;;  %v630_v48 = vmax.f32 %v622_v39, %v629_v34  ;;  %v1737_v16 = vadd.s32 8, %v1722_v59  ;;  %v1740_v19 = vadd.s32 24, %v1722_v59  ;;  %v1743_v20 = vadd.s32 32, %v1722_v59 }
  0xfa   : > { %v1698_v26 = vsub.f32 %v1245_v15, %v582_v0  ;;  %v627_v35 = vsel %vm610_vm1, %v1684_v18, -inf  ;;  %v1734_v15 = vadd.s32 112, %v1722_v59  ;;  %v1746_v21 = vadd.s32 40, %v1722_v59 }
  0xfb   : > { %v495_v23 = vpop.f32.mrf.mxu0  ;;  %v628_v49 = vmax.f32 %v620_v40, %v627_v35  ;;  %v1751_v25 = vadd.s32 56, %v1722_v59  ;;  %v1757_v29 = vadd.s32 72, %v1722_v59  ;;  %v1760_v30 = vadd.s32 88, %v1722_v59 }
  0xfc   : > { %v1700_v27 = vsub.f32 %v495_v23, %v577_v43  ;;  %v633_v43 = vsel %vm610_vm1, %v1698_v26, -inf  ;;  %v667_v23 = vcvt.s32.f32 %v1725_v62  ;;  %v1763_v31 = vadd.s32 96, %v1722_v59 }
  0xfd   : > { %v1248_v33 = vpop.f32.mrf.mxu0  ;;  %v634_v52 = vmax.f32 %v626_v47, %v633_v43  ;;  %v679_v34 = vcvt.s32.f32 %v1734_v15  ;;  %v1768_v35 = vadd.s32 104, %v1722_v59  ;;  %v665_v38 = vcvt.s32.f32 %v1722_v59 }
  0xfe   : > { %v631_v36 = vsel %vm610_vm1, %v1700_v27, -inf  ;;  %v1714_v37 = vsub.f32 %v1248_v33, %v592_v28  ;;  %v1754_v28 = vadd.s32 64, %v1722_v59  ;;  %v675_v33 = vcvt.s32.f32 %v1731_v8  ;;  %v818_v8 = vpop.trf.xlu0 }
  0xff   : > { %v505_v42 = vpop.f32.mrf.mxu0  ;;  %v632_v50 = vmax.f32 %v624_v41, %v631_v36  ;;  %v1771_v36 = vadd.s32 120, %v1722_v59  ;;  %v666_v39 = vcvt.s32.f32 %v1737_v16  ;;  %v668_v40 = vcvt.s32.f32 %v1740_v19 }
 0x100   : > { %v637_v45 = vsel %vm610_vm1, %v1714_v37, -inf  ;;  %v608_v46 = vsub.f32 %v505_v42, %v1658_v44  ;;  %v1728_v44 = vadd.s32 48, %v1722_v59  ;;  %v669_v42 = vcvt.s32.f32 %v1743_v20 }
 0x101   : > { %v638_v53 = vmax.f32 %v630_v48, %v637_v45  ;;  %v639_v56 = vmax.f32 %v632_v50, %v634_v52  ;;  %v670_v43 = vcvt.s32.f32 %v1746_v21  ;;  %v672_v45 = vcvt.s32.f32 %v1751_v25 }
 0x102   : > { %v635_v51 = vsel %vm610_vm1, %v608_v46, -inf  ;;  %v671_v24 = vcvt.s32.f32 %v1728_v44  ;;  %v673_v47 = vcvt.s32.f32 %v1754_v28  ;;  %v674_v48 = vcvt.s32.f32 %v1757_v29  ;;  %v819_v44 = vpop.trf.xlu0 }
 0x103   : > { %v636_v54 = vmax.f32 %v628_v49, %v635_v51  ;;  %v676_v49 = vcvt.s32.f32 %v1760_v30  ;;  %v677_v50 = vcvt.s32.f32 %v1763_v31 }
 0x105   : > { %v640_v57 = vmax.f32 %v636_v54, %v638_v53 }
 0x106   : > { %v820_v15 = vpop.trf.xlu0 }
 0x107   : > { %v641_v58 = vmax.f32 %v639_v56, %v640_v57 }
 0x109   : > { %v642_v60 = vrot.slane %v641_v58, 4 }
 0x10b   : > { %v643_v61 = vmax.f32 %v641_v58, %v642_v60 }
 0x10d   : > { %v644_v0 = vrot.slane %v643_v61, 2 }
 0x10f   : > { %v645_v22 = vmax.f32 %v643_v61, %v644_v0 }
 0x111   : > { %v646_v32 = vrot.slane %v645_v22, 1 }
 0x113   : > { %v647_v41 = vmax.f32 %v645_v22, %v646_v32 }
 0x115   : > { %vm683_vm2 = vcmp.ge.f32.partialorder %v1676_v13, %v647_v41  ;;  %vm687_vm3 = vcmp.ge.f32.partialorder %v1670_v10, %v647_v41  ;;  %vm691_vm4 = vcmp.ge.f32.partialorder %v1684_v18, %v647_v41  ;;  %vm695_vm5 = vcmp.ge.f32.partialorder %v608_v46, %v647_v41 }
 0x116   : > { %v699_v51 = vsel %vm683_vm2, %v667_v23, 128.0  ;;  %v703_v52 = vsel %vm687_vm3, %v671_v24, 128.0  ;;  %v707_v53 = vsel %vm691_vm4, %v675_v33, 128.0  ;;  %v711_v54 = vsel %vm695_vm5, %v679_v34, 128.0 }
 0x117   : > { %v715_v55 = vsel %vm610_vm1, %v699_v51, inf  ;;  %v721_v13 = vsel %vm610_vm1, %v703_v52, inf  ;;  %v678_v10 = vcvt.s32.f32 %v1768_v35  ;;  %v680_v18 = vcvt.s32.f32 %v1771_v36 }
 0x118   : > { %v722_v46 = vmin.f32 %v715_v55, %v721_v13  ;;  %v729_v56 = vsel %vm610_vm1, %v707_v53, inf  ;;  %vm681_vm6 = vcmp.ge.f32.partialorder %v1664_v2, %v647_v41  ;;  %vm682_vm7 = vcmp.ge.f32.partialorder %v1662_v1, %v647_v41 }
 0x119   : > { %v737_v57 = vsel %vm610_vm1, %v711_v54, inf  ;;  %vm684_vm8 = vcmp.ge.f32.partialorder %v1674_v12, %v647_v41  ;;  %vm685_vm9 = vcmp.ge.f32.partialorder %v1660_v63, %v647_v41  ;;  %vm686_vm10 = vcmp.ge.f32.partialorder %v1666_v3, %v647_v41 }
 0x11a   : > { %v730_v58 = vmin.f32 %v722_v46, %v729_v56  ;;  %vm688_vm11 = vcmp.ge.f32.partialorder %v1668_v6, %v647_v41  ;;  %vm689_vm12 = vcmp.ge.f32.partialorder %v1672_v11, %v647_v41  ;;  %vm693_vm13 = vcmp.ge.f32.partialorder %v1700_v27, %v647_v41 }
 0x11b   : > { %vm690_vm14 = vcmp.ge.f32.partialorder %v1678_v14, %v647_v41  ;;  %vm692_vm15 = vcmp.ge.f32.partialorder %v1682_v17, %v647_v41  ;;  %v697_v1 = vsel %vm681_vm6, %v665_v38, 128.0  ;;  %v698_v2 = vsel %vm682_vm7, %v666_v39, 128.0 }
 0x11c   : > { %v738_v63 = vmin.f32 %v730_v58, %v737_v57  ;;  %v700_v3 = vsel %vm684_vm8, %v668_v40, 128.0  ;;  %v701_v6 = vsel %vm685_vm9, %v669_v42, 128.0  ;;  %v702_v11 = vsel %vm686_vm10, %v670_v43, 128.0 }
 0x11d   : > { %vm694_vm0 = vcmp.ge.f32.partialorder %v1698_v26, %v647_v41  ;;  %vm696_vm2 = vcmp.ge.f32.partialorder %v1714_v37, %v647_v41  ;;  %v704_v12 = vsel %vm688_vm11, %v672_v45, 128.0  ;;  %v705_v14 = vsel %vm689_vm12, %v673_v47, 128.0 }
 0x11e   : > { %v706_v17 = vsel %vm690_vm14, %v674_v48, 128.0  ;;  %v708_v27 = vsel %vm692_vm15, %v676_v49, 128.0  ;;  %v709_v60 = vsel %vm693_vm13, %v677_v50, 128.0  ;;  %v713_v61 = vsel %vm610_vm1, %v697_v1, inf }
 0x11f   : > { %v714_v26 = vsel %vm610_vm1, %v698_v2, inf  ;;  %v716_v37 = vsel %vm610_vm1, %v700_v3, inf  ;;  %v717_v0 = vsel %vm610_vm1, %v701_v6, inf  ;;  %v719_v22 = vsel %vm610_vm1, %v702_v11, inf }
 0x120   : > { %v710_v32 = vsel %vm694_vm0, %v678_v10, 128.0  ;;  %v718_v36 = vmin.f32 %v713_v61, %v717_v0  ;;  %v720_v41 = vmin.f32 %v714_v26, %v719_v22  ;;  %v723_v51 = vsel %vm610_vm1, %v704_v12, inf }
 0x121   : > { %v712_v52 = vsel %vm696_vm2, %v680_v18, 128.0  ;;  %v724_v53 = vmin.f32 %v716_v37, %v723_v51  ;;  %v725_v54 = vsel %vm610_vm1, %v705_v14, inf  ;;  %v727_v55 = vsel %vm610_vm1, %v706_v17, inf }
 0x122   : > { %v726_v13 = vmin.f32 %v718_v36, %v725_v54  ;;  %v728_v46 = vmin.f32 %v720_v41, %v727_v55  ;;  %v731_v56 = vsel %vm610_vm1, %v708_v27, inf  ;;  %v733_v58 = vsel %vm610_vm1, %v709_v60, inf }
 0x123   : > { %v732_v57 = vmin.f32 %v724_v53, %v731_v56  ;;  %v735_v1 = vsel %vm610_vm1, %v710_v32, inf  ;;  %v739_v6 = vsel %vm610_vm1, %v712_v52, inf  ;;  %v1429_v36 = vmov 1.0  }
 0x124   : > { %v734_v2 = vmin.f32 %v726_v13, %v733_v58  ;;  %v736_v3 = vmin.f32 %v728_v46, %v735_v1  ;;  %vm751_vm6 = vcmask 122880  }
 0x125   : > { %v740_v11 = vmin.f32 %v732_v57, %v739_v6 }
 0x126   : > { %v741_v12 = vmin.f32 %v734_v2, %v736_v3 }
 0x127   : > { %v742_v61 = vmin.f32 %v738_v63, %v740_v11 }
 0x129   : > { %v743_v14 = vmin.f32 %v741_v12, %v742_v61 }
 0x12b   : > { %v744_v26 = vrot.slane %v743_v14, 4 }
 0x12d   : > { %v745_v17 = vmin.f32 %v743_v14, %v744_v26 }
 0x12f   : > { %v746_v37 = vrot.slane %v745_v17, 2 }
 0x131   : > { %v747_v0 = vmin.f32 %v745_v17, %v746_v37 }
 0x133   : > { %v748_v22 = vrot.slane %v747_v0, 1 }
 0x135   : > { %v749_v27 = vmin.f32 %v747_v0, %v748_v22 }
 0x137   : > { %vm768_vm3 = vcmp.eq.f32.partialorder %v680_v18, %v749_v27  ;;  %vm767_vm4 = vcmp.eq.f32.partialorder %v679_v34, %v749_v27  ;;  %vm766_vm5 = vcmp.eq.f32.partialorder %v678_v10, %v749_v27  ;;  %v1287_v63 = vtrunc.f32 %v749_v27 }
 0x138   : > { %1249 = vmatprep.subr.msk.mxu1 %vm768_vm3, %v1429_v36  ;;  %vm765_vm7 = vcmp.eq.f32.partialorder %v677_v50, %v749_v27  ;;  %vm764_vm8 = vcmp.eq.f32.partialorder %v676_v49, %v749_v27  ;;  %vm763_vm9 = vcmp.eq.f32.partialorder %v675_v33, %v749_v27  ;;  %vm762_vm10 = vcmp.eq.f32.partialorder %v674_v48, %v749_v27 }
 0x139   : > { %1250 = vmatpush3.msk.msra.mxu1 %vm768_vm3, %v1429_v36  ;;  %v1288_v18 = vcvt.f32.s32 %v1287_v63  ;;  %vm761_vm11 = vcmp.eq.f32.partialorder %v673_v47, %v749_v27  ;;  %vm760_vm12 = vcmp.eq.f32.partialorder %v672_v45, %v749_v27  ;;  %vm759_vm13 = vcmp.eq.f32.partialorder %v671_v24, %v749_v27 }
 0x13a   : > { %1251 = vmatprep.subr.msk.mxu1 %vm767_vm4, %v1429_v36  ;;  %vm758_vm14 = vcmp.eq.f32.partialorder %v670_v43, %v749_v27  ;;  %vm757_vm15 = vcmp.eq.f32.partialorder %v669_v42, %v749_v27  ;;  %vm756_vm0 = vcmp.eq.f32.partialorder %v668_v40, %v749_v27  ;;  %vm755_vm2 = vcmp.eq.f32.partialorder %v667_v23, %v749_v27 }
 0x13b   : > { %1252 = vmatpush3.msk.msra.mxu1 %vm767_vm4, %v1429_v36  ;;  %752 = vst.msk [vmem:[%s1857_s12] sm:$0x1] %vm751_vm6, %v1288_v18  ;;  %vm754_vm3 = vcmp.eq.f32.partialorder %v666_v39, %v749_v27  ;;  %vm753_vm4 = vcmp.eq.f32.partialorder %v665_v38, %v749_v27 }
 0x13c   : > { %1253 = vmatprep.subr.msk.mxu1 %vm766_vm5, %v1429_v36 }
 0x13d   : > { %1254 = vmatpush3.msk.msra.mxu1 %vm766_vm5, %v1429_v36 }
 0x13e   : > { %1255 = vmatprep.subr.msk.mxu1 %vm765_vm7, %v1429_v36 }
 0x13f   : > { %1256 = vmatpush3.msk.msra.mxu1 %vm765_vm7, %v1429_v36 }
 0x140   : > { %1257 = vmatprep.subr.msk.mxu1 %vm764_vm8, %v1429_v36 }
 0x141   : > { %1258 = vmatpush3.msk.msra.mxu1 %vm764_vm8, %v1429_v36 }
 0x142   : > { %1259 = vmatprep.subr.msk.mxu1 %vm763_vm9, %v1429_v36 }
 0x143   : > { %1260 = vmatpush3.msk.msra.mxu1 %vm763_vm9, %v1429_v36 }
 0x144   : > { %1261 = vmatprep.subr.msk.mxu1 %vm762_vm10, %v1429_v36 }
 0x145   : > { %1262 = vmatpush3.msk.msra.mxu1 %vm762_vm10, %v1429_v36 }
 0x146   : > { %1263 = vmatprep.subr.msk.mxu1 %vm761_vm11, %v1429_v36 }
 0x147   : > { %1264 = vmatpush3.msk.msra.mxu1 %vm761_vm11, %v1429_v36 }
 0x148   : > { %1265 = vmatprep.subr.msk.mxu1 %vm760_vm12, %v1429_v36 }
 0x149   : > { %1266 = vmatpush3.msk.msra.mxu1 %vm760_vm12, %v1429_v36 }
 0x14a   : > { %1267 = vmatprep.subr.msk.mxu1 %vm759_vm13, %v1429_v36 }
 0x14b   : > { %1268 = vmatpush3.msk.msra.mxu1 %vm759_vm13, %v1429_v36 }
 0x14c   : > { %1269 = vmatprep.subr.msk.mxu1 %vm758_vm14, %v1429_v36 }
 0x14d   : > { %1270 = vmatpush3.msk.msra.mxu1 %vm758_vm14, %v1429_v36 }
 0x14e   : > { %1271 = vmatprep.subr.msk.mxu1 %vm757_vm15, %v1429_v36 }
 0x14f   : > { %1272 = vmatpush3.msk.msra.mxu1 %vm757_vm15, %v1429_v36 }
 0x150   : > { %1273 = vmatprep.subr.msk.mxu1 %vm756_vm0, %v1429_v36 }
 0x151   : > { %1274 = vmatpush3.msk.msra.mxu1 %vm756_vm0, %v1429_v36 }
 0x152   : > { %1275 = vmatprep.subr.msk.mxu1 %vm755_vm2, %v1429_v36 }
 0x153   : > { %1276 = vmatpush3.msk.msra.mxu1 %vm755_vm2, %v1429_v36 }
 0x154   : > { %1277 = vmatprep.subr.msk.mxu1 %vm754_vm3, %v1429_v36 }
 0x155   : > { %1278 = vmatpush3.msk.msra.mxu1 %vm754_vm3, %v1429_v36 }
 0x156   : > { %1279 = vmatprep.subr.msk.mxu1 %vm753_vm4, %v1429_v36 }
 0x157   : > { %1280 = vmatpush3.msk.msra.mxu1 %vm753_vm4, %v1429_v36 }
 0x158   : > { %1282 = vmatmul.mubr.f32.vlgmr.msra.gmra.mxu1 %v818_v8 }
 0x159   : > { %1284 = vmatprep.mubr.f32.mxu1 %v819_v44 }
 0x15c   : > { %1285 = vmatmul.mubr.f32.gmra.mxu1 %v820_v15 }
 0x218   : > { %v1283_v62 = vpop.f32.mrf.mxu1 }
 0x219   : > { %919 = vst.msk [vmem:[%s277_s13 + $0x8] sm:$0xff] %vm610_vm1, %v1283_v62  ;;  %v923_v16 = vsub.f32 %v1283_v62, %v1548_v7 }
 0x21a   : > { %v899_v19 = vpop.f32.mrf.mxu1 }
 0x21b   : > { %918 = vst.msk [vmem:[%s277_s13] sm:$0xff] %vm610_vm1, %v899_v19  ;;  %v922_v59 = vsub.f32 %v899_v19, %v1555_v9  ;;  %v927_v21 = vmul.f32 %v923_v16, %v923_v16 }
 0x21c   : > { %v1286_v20 = vpop.f32.mrf.mxu1 }
 0x21d   : > { %v926_v23 = vmul.f32 %v922_v59, %v922_v59  ;;  %921 = vst.msk [vmem:[%s277_s13 + $0x18] sm:$0xff] %vm610_vm1, %v1286_v20  ;;  %v925_v24 = vsub.f32 %v1286_v20, %v1539_v4  ;;  %v931_v29 = vsel %vm610_vm1, %v927_v21, 0.0 }
 0x21e   : > { %v909_v25 = vpop.f32.mrf.mxu1 }
 0x21f   : > { %v930_v28 = vsel %vm610_vm1, %v926_v23, 0.0  ;;  %920 = vst.msk [vmem:[%s277_s13 + $0x10] sm:$0xff] %vm610_vm1, %v909_v25  ;;  %v924_v7 = vsub.f32 %v909_v25, %v1541_v5  ;;  %v929_v9 = vmul.f32 %v925_v24, %v925_v24 }
 0x220   : > { %v932_v31 = vadd.f32 %v931_v29, %v930_v28 }
 0x221   : > { %v928_v30 = vmul.f32 %v924_v7, %v924_v7  ;;  %v935_v4 = vsel %vm610_vm1, %v929_v9, 0.0 }
 0x223   : > { %v933_v33 = vsel %vm610_vm1, %v928_v30, 0.0 }
 0x224   : > { %v934_v34 = vadd.f32 %v933_v33, %v932_v31 }
 0x226   : > { %v936_v35 = vadd.f32 %v935_v4, %v934_v34 }
 0x228   : > { %937 = vadd.xlane.f32.xlu1 %v936_v35 }
 0x229   : > { %1363 = shalt.err (!%p1360_p5)
}
 0x22a   : > { %s1364_s21 = scalar_lea.hbm %s978_s24, 16  ;;  %s1368_s15 = scalar_lea.hbm %s1948_s4, 32 }
 0x22b   : > { %p1365_p6 = scmp.ne.s32.totalorder %s978_s24, %s1364_s21  ;;  %p1369_p10 = scmp.lt.s32.totalorder %s978_s24, %s1948_s4 }
 0x22c   : > { %p1370_p11 = scmp.lt.s32.totalorder %s1368_s15, %s1364_s21 }
 0x22d   : > { %p1366_p7 = pnand %p1365_p6, %p1501_p4 }
 0x22e   : > { %p1371_p12 = por %p1370_p11, %p1369_p10 }
 0x22f   : > { %p1367_p9 = pneg %p1366_p7 }
 0x231   : > { %p1372_p13 = pnand %p1371_p12, %p1367_p9 }
 0x233   : > { %1375 = shalt.err (!%p1372_p13)
}
 0x234   : > { %1291 = dma.vmem_to_hbm [thread:$0]  (%p1501_p4), %s981_s25, 16, %s978_s24, %s958_s27   ;;  %vm947_vm1 = vcmask 0  }
 0x235   : > { %s283_s29 = scalar_lea.vmem %s1949_s5, %s1525_s9 }
 0x2b1   : > { %v938_v5 = vpop.xlane.xlu1 %937 }
 0x2b2   : > { %v939_v38 = vrot.slane %v938_v5, 4 }
 0x2b4   : > { %v940_v39 = vadd.f32 %v939_v38, %v938_v5 }
 0x2b6   : > { %v941_v40 = vrot.slane %v940_v39, 2 }
 0x2b8   : > { %v942_v42 = vadd.f32 %v941_v40, %v940_v39 }
 0x2ba   : > { %v943_v43 = vrot.slane %v942_v42, 1 }
 0x2bc   : > { %v944_v45 = vadd.f32 %v943_v43, %v942_v42 }
 0x2be   : > { %1289 = vpush %v944_v45 }
 0x2ef   : > { %s1290_s7 = spop %1289 }
 0x2f0   : > { %v946_v47 = vstv %s1290_s7 }
 0x2f1   : > { %948 = vst.msk [vmem:[%s283_s29] sm:$0x1] %vm947_vm1, %v946_v47 }
 0x2f2 PF: > { %p1297_p4 = scmp.ge.s32.totalorder %s1426_s23, 2  ;;  %s1006_s28 = sand.u32 1, %s1406_s18  }
 0x2f3   : > { %s1007_s24 = scalar_lea.sflag [#allocation3], %s1006_s28 }
 0x2f4   : > { %p1294_p0 = pnand %p1297_p4, %p1508_p8 }
 0x2f6   : > { %p1295_p1 = pneg %p1294_p0 }
 0x2f8   : > { %1401 = dma.done.wait (%p1295_p1), %s1007_s24, 16  }
 0x2f9   : > { %1403 = vsyncadd (%p1295_p1), %s1007_s24, 4294967280  ;;  %s19_s23 = sadd.s32 1, %s1426_s23   ;;  %s1952_s18 = smov %s1410_s19 }
 0x2fa   : > { %p16_p2 = scmp.ge.s32.totalorder %s19_s23, 4   ;;  %s1953_s19 = smov %s1414_s20 }
 0x2fb   : > { %s1954_s20 = smov %s1514_s6  ;;  %s1955_s21 = smov %s1422_s22 }
 0x2fc   : > { %s1956_s22 = smov %s1958_s26  ;;  %18 = sbr.rel (!%p16_p2) target bundleno = 4 (0x4), region = 91 }
 0x301   :  { %1020 = vsyncpa [#allocation3], 1 }
 0x302   :  { %1022 = vsyncpa [#allocation3 + $0x1], 1 }

</bundles_post_ra>
